<compile_context>
chip_gen: v5e
topology: v5e:2x2
jax: 0.10.0
libtpu: 0.0.40
codegen_flags: <defaults>
</compile_context>

<pallas_src>
import functools

import jax
import jax.numpy as jnp
from jax.experimental import pallas as pl
from jax.experimental.pallas import tpu as pltpu


# ---------------------------------------------------------------------------
# Kernel: fused (1x1 conv + BN folded) x3 + LeakyReLU + final Linear
# ---------------------------------------------------------------------------
def _disc_conv_kernel(x_ref, w1_ref, b123_ref, w2_ref, w3_ref, wfc_ref, bfc_ref,
                      out_ref, *, negative_slope):
    def lrelu(v):                       # f32 elementwise on the VPU
        return jnp.where(v >= 0, v, negative_slope * v)

    b123 = b123_ref[...]                # (3, nh) f32 folded-BN biases

    h = jnp.dot(x_ref[...].astype(w1_ref.dtype), w1_ref[...],
                preferred_element_type=jnp.float32) + b123[0:1, :]
    h = lrelu(h)
    h = jnp.dot(h.astype(w2_ref.dtype), w2_ref[...],
                preferred_element_type=jnp.float32) + b123[1:2, :]
    h = lrelu(h)
    h = jnp.dot(h.astype(w3_ref.dtype), w3_ref[...],
                preferred_element_type=jnp.float32) + b123[2:3, :]
    h = lrelu(h)
    out = jnp.dot(h.astype(wfc_ref.dtype), wfc_ref[...],
                  preferred_element_type=jnp.float32) + bfc_ref[...]
    out_ref[...] = out.astype(out_ref.dtype)


# ---------------------------------------------------------------------------
# Parameter helpers (PyTorch layout: conv weight (cout, cin), linear (nout, nh))
# ---------------------------------------------------------------------------
def init_params(key, nin, nh, nout):
    keys = iter(jax.random.split(key, 32))

    def rnd(shape, scale=0.1):
        return scale * jax.random.normal(next(keys), shape, dtype=jnp.float32)

    blocks = []
    for cin, cout in [(nin, nh), (nh, nh), (nh, nh)]:
        blocks.append(dict(
            w=rnd((cout, cin)),
            b=rnd((cout,)),
            gamma=1.0 + rnd((cout,), 0.05),
            beta=rnd((cout,), 0.05),
            mean=rnd((cout,), 0.05),
            var=1.0 + jnp.abs(rnd((cout,), 0.05)),
        ))
    return dict(blocks=blocks, wfc=rnd((nout, nh)), bfc=rnd((nout,)))


def _fold_bn(block, eps):
    # BN(eval) o Conv1x1  ==  x @ W_eff + b_eff
    scale = block["gamma"] * jax.lax.rsqrt(block["var"] + eps)    # (cout,)
    w_eff = (block["w"] * scale[:, None]).T                       # (cin, cout)
    b_eff = scale * (block["b"] - block["mean"]) + block["beta"]  # (cout,)
    return w_eff, b_eff


def _round_up(x, m):
    return ((x + m - 1) // m) * m


def _choose_row_tile(batch, *, max_tile=1024, min_steps=2):
    """Row tile: big enough to amortize per-grid-step overhead, small enough to
    leave VMEM headroom on v7x, and giving >= 2 grid steps for non-trivial B so
    the single 'parallel' axis can be sharded across both v7x TensorCores."""
    if batch <= 8:
        return batch
    return min(max_tile, _round_up(pl.cdiv(batch, min_steps), 8))


# ---------------------------------------------------------------------------
# Wrapper
# ---------------------------------------------------------------------------
def disc_conv_forward(x, params, *, eps=1e-5, negative_slope=0.01):
    """x: (B, nin, 1, 1) NCHW  ->  (B, nout)."""
    B, nin, H, W = x.shape
    assert H == 1 and W == 1, "DiscConv is only shape-consistent for 1x1 spatial"
    x2 = x.reshape(B, nin).astype(jnp.float32)   # free layout op outside kernel

    (w1, b1), (w2, b2), (w3, b3) = [_fold_bn(b, eps) for b in params["blocks"]]
    nh = w1.shape[1]
    nout = params["wfc"].shape[0]
    nout_p = _round_up(nout, 128)                # lane-dense output stores

    # bf16 MXU operands; accumulation stays f32 via preferred_element_type.
    # Layer 1's contraction dim is nin (often tiny) -> keep f32 when nin < 16.
    w1 = w1.astype(jnp.bfloat16 if nin >= 16 else jnp.float32)
    w2 = w2.astype(jnp.bfloat16)
    w3 = w3.astype(jnp.bfloat16)
    wfc = jnp.zeros((nh, nout_p), jnp.float32)
    wfc = wfc.at[:, :nout].set(params["wfc"].T.astype(jnp.float32)).astype(jnp.bfloat16)
    bfc = jnp.zeros((1, nout_p), jnp.float32).at[:, :nout].set(
        params["bfc"].astype(jnp.float32).reshape(1, -1))

    # Pack the three hidden-layer biases into a single (3, nh) operand.
    b123 = jnp.stack([b1, b2, b3], axis=0).astype(jnp.float32)

    tb = _choose_row_tile(B)
    grid = (pl.cdiv(B, tb),)

    def row_map(i):
        return (i, 0)

    def const_map(i):
        return (0, 0)

    kernel = functools.partial(_disc_conv_kernel, negative_slope=negative_slope)

    out = pl.pallas_call(
        kernel,
        out_shape=jax.ShapeDtypeStruct((B, nout_p), jnp.float32),
        grid_spec=pltpu.PrefetchScalarGridSpec(
            num_scalar_prefetch=0,
            grid=grid,
            in_specs=[
                pl.BlockSpec((tb, nin), row_map),
                pl.BlockSpec((nin, nh), const_map),
                pl.BlockSpec((3, nh), const_map),
                pl.BlockSpec((nh, nh), const_map),
                pl.BlockSpec((nh, nh), const_map),
                pl.BlockSpec((nh, nout_p), const_map),
                pl.BlockSpec((1, nout_p), const_map),
            ],
            out_specs=pl.BlockSpec((tb, nout_p), row_map),
        ),
        compiler_params=pltpu.CompilerParams(
            dimension_semantics=("parallel",),
            vmem_limit_bytes=32 * 1024 * 1024,
        ),
    )(x2, w1, b123, w2, w3, wfc, bfc)

    return out[:, :nout]


# ---------------------------------------------------------------------------
# Pure-JAX reference of the PyTorch module (eval-mode BatchNorm), in f32
# ---------------------------------------------------------------------------
def ref_forward(x, params, *, eps=1e-5, negative_slope=0.01):
    B, nin, H, W = x.shape
    h = x.reshape(B, nin).astype(jnp.float32)
    for blk in params["blocks"]:
        y = h @ blk["w"].T + blk["b"]                                   # 1x1 conv
        y = blk["gamma"] * (y - blk["mean"]) / jnp.sqrt(blk["var"] + eps) + blk["beta"]
        h = jnp.where(y >= 0, y, negative_slope * y)                    # LeakyReLU
    # torch.squeeze: (B, nh, 1, 1) -> (B, nh) for B > 1
    # TODO(synk): torch.squeeze would also drop the batch dim when B == 1; we keep (B, nout).
    return h @ params["wfc"].T + params["bfc"]


if __name__ == "__main__":
    key = jax.random.PRNGKey(0)
    nin, nh, nout = 4, 512, 2
    kx1, kx2, kp = jax.random.split(key, 3)
    params = init_params(kp, nin, nh, nout)

    # bf16 MXU operands with f32 accumulation -> compare against the f32
    # reference with a correspondingly looser tolerance (~1e-2-level relative).
    tol = dict(rtol=5e-2, atol=5e-2)

    # Small batch: single grid step.
    x_small = jax.random.normal(kx1, (2, nin, 1, 1), dtype=jnp.float32)
    out_small = disc_conv_forward(x_small, params)
    jax.block_until_ready(out_small)
    ref_small = ref_forward(x_small, params)
    assert out_small.shape == (2, nout), out_small.shape
    err_small = float(jnp.max(jnp.abs(out_small - ref_small)))
    assert jnp.allclose(out_small, ref_small, **tol), f"max abs err {err_small}"

    # Larger batch: multi-step grid with a masked tail block.
    x_big = jax.random.normal(kx2, (52, nin, 1, 1), dtype=jnp.float32)
    out_big = disc_conv_forward(x_big, params)
    jax.block_until_ready(out_big)
    ref_big = ref_forward(x_big, params)
    assert out_big.shape == (52, nout), out_big.shape
    err_big = float(jnp.max(jnp.abs(out_big - ref_big)))
    assert jnp.allclose(out_big, ref_big, **tol), f"max abs err {err_big}"

    print("KERNEL_OK")
</pallas_src>

<mosaic_0001>
module attributes {stable_mosaic.version = 11 : i64} {
  func.func @_disc_conv_kernel(%arg0: i32, %arg1: memref<2x4xf32, #tpu.memory_space<vmem>>, %arg2: memref<4x512xf32, #tpu.memory_space<vmem>>, %arg3: memref<3x512xf32, #tpu.memory_space<vmem>>, %arg4: memref<512x512xbf16, #tpu.memory_space<vmem>>, %arg5: memref<512x512xbf16, #tpu.memory_space<vmem>>, %arg6: memref<512x128xbf16, #tpu.memory_space<vmem>>, %arg7: memref<1x128xf32, #tpu.memory_space<vmem>>, %arg8: memref<2x128xf32, #tpu.memory_space<vmem>>) attributes {dimension_semantics = [#tpu.dimension_semantics<parallel>], iteration_bounds = array<i64: 1>, scalar_prefetch = 0 : i64, scratch_operands = 0 : i64, tpu.core_type = #tpu.core_type<tc>, window_params = [{transform_indices = @transform_0, window_bounds = array<i64: 2, 4>}, {pipeline_mode = #tpu.pipeline_mode<synchronous>, transform_indices = @transform_1, window_bounds = array<i64: 4, 512>}, {pipeline_mode = #tpu.pipeline_mode<synchronous>, transform_indices = @transform_2, window_bounds = array<i64: 3, 512>}, {pipeline_mode = #tpu.pipeline_mode<synchronous>, transform_indices = @transform_3, window_bounds = array<i64: 512, 512>}, {pipeline_mode = #tpu.pipeline_mode<synchronous>, transform_indices = @transform_4, window_bounds = array<i64: 512, 512>}, {pipeline_mode = #tpu.pipeline_mode<synchronous>, transform_indices = @transform_5, window_bounds = array<i64: 512, 128>}, {pipeline_mode = #tpu.pipeline_mode<synchronous>, transform_indices = @transform_6, window_bounds = array<i64: 1, 128>}, {transform_indices = @transform_7, window_bounds = array<i64: 2, 128>}]} {
    %c0 = arith.constant 0 : index
    %c0_0 = arith.constant 0 : index
    %0 = vector.load %arg3[%c0, %c0_0] : memref<3x512xf32, #tpu.memory_space<vmem>>, vector<3x512xf32>
    %c0_1 = arith.constant 0 : index
    %c0_2 = arith.constant 0 : index
    %1 = vector.load %arg1[%c0_1, %c0_2] : memref<2x4xf32, #tpu.memory_space<vmem>>, vector<2x4xf32>
    %c0_3 = arith.constant 0 : index
    %c0_4 = arith.constant 0 : index
    %2 = vector.load %arg2[%c0_3, %c0_4] : memref<4x512xf32, #tpu.memory_space<vmem>>, vector<4x512xf32>
    %cst = arith.constant dense<0.000000e+00> : vector<2x512xf32>
    %3 = tpu.matmul %1, %2, %cst {dimension_numbers = #tpu.dot_dimension_numbers<[1], [0], [0], [1], [0, 0, 1, 1], [], []>} : vector<2x4xf32>, vector<4x512xf32>, vector<2x512xf32> -> vector<2x512xf32>
    %4 = vector.extract_strided_slice %0 {offsets = [0, 0], sizes = [1, 512], strides = [1, 1]} : vector<3x512xf32> to vector<1x512xf32>
    %5 = vector.broadcast %4 : vector<1x512xf32> to vector<2x512xf32>
    %6 = arith.addf %3, %5 : vector<2x512xf32>
    %cst_5 = arith.constant 0.000000e+00 : f32
    %7 = vector.broadcast %cst_5 : f32 to vector<2x512xf32>
    %8 = arith.cmpf oge, %6, %7 : vector<2x512xf32>
    %cst_6 = arith.constant 0.00999999977 : f32
    %9 = vector.broadcast %cst_6 : f32 to vector<2x512xf32>
    %10 = arith.mulf %9, %6 : vector<2x512xf32>
    %11 = arith.select %8, %6, %10 : vector<2x512xi1>, vector<2x512xf32>
    %12 = arith.truncf %11 : vector<2x512xf32> to vector<2x512xbf16>
    %c0_7 = arith.constant 0 : index
    %c0_8 = arith.constant 0 : index
    %13 = vector.load %arg4[%c0_7, %c0_8] : memref<512x512xbf16, #tpu.memory_space<vmem>>, vector<512x512xbf16>
    %cst_9 = arith.constant dense<0.000000e+00> : vector<2x512xf32>
    %14 = tpu.matmul %12, %13, %cst_9 {dimension_numbers = #tpu.dot_dimension_numbers<[1], [0], [0], [1], [0, 0, 1, 1], [], []>} : vector<2x512xbf16>, vector<512x512xbf16>, vector<2x512xf32> -> vector<2x512xf32>
    %15 = vector.extract_strided_slice %0 {offsets = [1, 0], sizes = [1, 512], strides = [1, 1]} : vector<3x512xf32> to vector<1x512xf32>
    %16 = vector.broadcast %15 : vector<1x512xf32> to vector<2x512xf32>
    %17 = arith.addf %14, %16 : vector<2x512xf32>
    %cst_10 = arith.constant 0.000000e+00 : f32
    %18 = vector.broadcast %cst_10 : f32 to vector<2x512xf32>
    %19 = arith.cmpf oge, %17, %18 : vector<2x512xf32>
    %cst_11 = arith.constant 0.00999999977 : f32
    %20 = vector.broadcast %cst_11 : f32 to vector<2x512xf32>
    %21 = arith.mulf %20, %17 : vector<2x512xf32>
    %22 = arith.select %19, %17, %21 : vector<2x512xi1>, vector<2x512xf32>
    %23 = arith.truncf %22 : vector<2x512xf32> to vector<2x512xbf16>
    %c0_12 = arith.constant 0 : index
    %c0_13 = arith.constant 0 : index
    %24 = vector.load %arg5[%c0_12, %c0_13] : memref<512x512xbf16, #tpu.memory_space<vmem>>, vector<512x512xbf16>
    %cst_14 = arith.constant dense<0.000000e+00> : vector<2x512xf32>
    %25 = tpu.matmul %23, %24, %cst_14 {dimension_numbers = #tpu.dot_dimension_numbers<[1], [0], [0], [1], [0, 0, 1, 1], [], []>} : vector<2x512xbf16>, vector<512x512xbf16>, vector<2x512xf32> -> vector<2x512xf32>
    %26 = vector.extract_strided_slice %0 {offsets = [2, 0], sizes = [1, 512], strides = [1, 1]} : vector<3x512xf32> to vector<1x512xf32>
    %27 = vector.broadcast %26 : vector<1x512xf32> to vector<2x512xf32>
    %28 = arith.addf %25, %27 : vector<2x512xf32>
    %cst_15 = arith.constant 0.000000e+00 : f32
    %29 = vector.broadcast %cst_15 : f32 to vector<2x512xf32>
    %30 = arith.cmpf oge, %28, %29 : vector<2x512xf32>
    %cst_16 = arith.constant 0.00999999977 : f32
    %31 = vector.broadcast %cst_16 : f32 to vector<2x512xf32>
    %32 = arith.mulf %31, %28 : vector<2x512xf32>
    %33 = arith.select %30, %28, %32 : vector<2x512xi1>, vector<2x512xf32>
    %34 = arith.truncf %33 : vector<2x512xf32> to vector<2x512xbf16>
    %c0_17 = arith.constant 0 : index
    %c0_18 = arith.constant 0 : index
    %35 = vector.load %arg6[%c0_17, %c0_18] : memref<512x128xbf16, #tpu.memory_space<vmem>>, vector<512x128xbf16>
    %cst_19 = arith.constant dense<0.000000e+00> : vector<2x128xf32>
    %36 = tpu.matmul %34, %35, %cst_19 {dimension_numbers = #tpu.dot_dimension_numbers<[1], [0], [0], [1], [0, 0, 1, 1], [], []>} : vector<2x512xbf16>, vector<512x128xbf16>, vector<2x128xf32> -> vector<2x128xf32>
    %c0_20 = arith.constant 0 : index
    %c0_21 = arith.constant 0 : index
    %37 = vector.load %arg7[%c0_20, %c0_21] : memref<1x128xf32, #tpu.memory_space<vmem>>, vector<1x128xf32>
    %38 = vector.broadcast %37 : vector<1x128xf32> to vector<2x128xf32>
    %39 = arith.addf %36, %38 : vector<2x128xf32>
    %c0_22 = arith.constant 0 : index
    %c0_23 = arith.constant 0 : index
    %40 = vector.load %arg8[%c0_22, %c0_23] : memref<2x128xf32, #tpu.memory_space<vmem>>, vector<2x128xf32>
    tpu.vector_store %arg8[%c0_22, %c0_23], %39 {strides = array<i32>} : memref<2x128xf32, #tpu.memory_space<vmem>>, vector<2x128xf32>,
    return
  }
  func.func @transform_0(%arg0: i32) -> (i32, i32) {
    %c0_i32 = arith.constant 0 : i32
    %c0_i32_0 = arith.constant 0 : i32
    return %arg0, %c0_i32 : i32, i32
  }
  func.func @transform_1(%arg0: i32) -> (i32, i32) {
    %c0_i32 = arith.constant 0 : i32
    %c0_i32_0 = arith.constant 0 : i32
    %c0_i32_1 = arith.constant 0 : i32
    return %c0_i32, %c0_i32_0 : i32, i32
  }
  func.func @transform_2(%arg0: i32) -> (i32, i32) {
    %c0_i32 = arith.constant 0 : i32
    %c0_i32_0 = arith.constant 0 : i32
    %c0_i32_1 = arith.constant 0 : i32
    return %c0_i32, %c0_i32_0 : i32, i32
  }
  func.func @transform_3(%arg0: i32) -> (i32, i32) {
    %c0_i32 = arith.constant 0 : i32
    %c0_i32_0 = arith.constant 0 : i32
    %c0_i32_1 = arith.constant 0 : i32
    return %c0_i32, %c0_i32_0 : i32, i32
  }
  func.func @transform_4(%arg0: i32) -> (i32, i32) {
    %c0_i32 = arith.constant 0 : i32
    %c0_i32_0 = arith.constant 0 : i32
    %c0_i32_1 = arith.constant 0 : i32
    return %c0_i32, %c0_i32_0 : i32, i32
  }
  func.func @transform_5(%arg0: i32) -> (i32, i32) {
    %c0_i32 = arith.constant 0 : i32
    %c0_i32_0 = arith.constant 0 : i32
    %c0_i32_1 = arith.constant 0 : i32
    return %c0_i32, %c0_i32_0 : i32, i32
  }
  func.func @transform_6(%arg0: i32) -> (i32, i32) {
    %c0_i32 = arith.constant 0 : i32
    %c0_i32_0 = arith.constant 0 : i32
    %c0_i32_1 = arith.constant 0 : i32
    return %c0_i32, %c0_i32_0 : i32, i32
  }
  func.func @transform_7(%arg0: i32) -> (i32, i32) {
    %c0_i32 = arith.constant 0 : i32
    %c0_i32_0 = arith.constant 0 : i32
    return %arg0, %c0_i32 : i32, i32
  }
}

</mosaic_0001>

<bundles_post_ra>
// kernel: tpu_custom_call.1
= control target key start
LH: loop header
LB: loop body
LE: loop exit
PB: predicated region body
PF: predicated region fallthrough
CT: control target
= control target key end

     0   :  { %12 = vsyncpa [#allocation3], 0  ;;  %s4395_s0 = inlined_call_operand.hbm [shape: f32[2,4], index: 0, kind: input, shape index: {}]   ;;  %s4396_s1 = inlined_call_operand.hbm [shape: f32[4,512], index: 1, kind: input, shape index: {}]   ;;  %s4397_s2 = inlined_call_operand.hbm [shape: f32[3,512], index: 2, kind: input, shape index: {}]   ;;  %s4398_s3 = inlined_call_operand.hbm [shape: bf16[512,512], index: 3, kind: input, shape index: {}]   ;;  %s4399_s4 = inlined_call_operand.hbm [shape: bf16[512,512], index: 4, kind: input, shape index: {}]   ;;  %s4400_s5 = inlined_call_operand.hbm [shape: bf16[512,128], index: 5, kind: input, shape index: {}]   ;;  %s4401_s6 = inlined_call_operand.vmem [shape: f32[1,128], index: 6, kind: input, shape index: {}]   ;;  %s4402_s7 = inlined_call_operand.hbm [shape: f32[2,128], index: 7, kind: output, shape index: {}]  }
   0x1   :  { %13 = vsyncpa [#allocation6], 0 }
   0x2   :  { %14 = vsyncpa [#allocation9], 0 }
   0x3   :  { %15 = vsyncpa [#allocation12], 0  ;;  %s33_s26 = sshll.u32 %s4396_s1, 4  ;;  %s34_s26 = int_to_ptr.hbm [resolvable:$true] %s33_s26 }
   0x4   :  { %16 = vsyncpa [#allocation4], 0  ;;  %s4233_s27 = smov [#allocation5]   ;;  %s54_s8 = sshll.u32 %s4398_s3, 4  ;;  %s55_s8 = int_to_ptr.hbm [resolvable:$true] %s54_s8 }
   0x5   :  { %s35_s28 = sshll.u32 %s4233_s27, 4  ;;  %s4234_s9 = smov [#allocation8]   ;;  %s36_s28 = int_to_ptr.vmem [resolvable:$true] %s35_s28 }
   0x6   :  { %38 = dma.hbm_to_vmem [thread:$0]  %s34_s26, 256, %s36_s28, [#allocation6]  }
   0x7   :  { %s56_s10 = sshll.u32 %s4234_s9, 4  ;;  %s4235_s11 = smov 256   ;;  %s57_s10 = int_to_ptr.vmem [resolvable:$true] %s56_s10 }
   0x8   :  { %s4236_s12 = smov 16   ;;  %s22_s1 = sshll.u32 %s4395_s0, 4  ;;  %s23_s1 = int_to_ptr.hbm [resolvable:$true] %s22_s1 }
   0x9   :  { %62 = dma.hbm_to_vmem [thread:$0]  %s55_s8, 16384, %s57_s10, [#allocation9], %s4235_s11, %s4235_s11, %s4236_s12  }
   0xa   :  { %s4237_s15 = smov [#allocation2]   ;;  %s44_s3 = sshll.u32 %s4397_s2, 4  ;;  %s45_s3 = int_to_ptr.hbm [resolvable:$true] %s44_s3 }
   0xb   :  { %s24_s16 = sshll.u32 %s4237_s15, 4  ;;  %s4238_s19 = smov [#allocation7]   ;;  %s25_s16 = int_to_ptr.vmem [resolvable:$true] %s24_s16 }
   0xc   :  { %27 = dma.hbm_to_vmem [thread:$0]  %s23_s1, 32, %s25_s16, [#allocation3]  }
   0xd   :  { %s46_s20 = sshll.u32 %s4238_s19, 4  ;;  %s67_s23 = sshll.u32 %s4399_s4, 4  ;;  %s47_s20 = int_to_ptr.vmem [resolvable:$true] %s46_s20  ;;  %s68_s23 = int_to_ptr.hbm [resolvable:$true] %s67_s23 }
   0xe   :  { %49 = dma.hbm_to_vmem [thread:$0]  %s45_s3, 256, %s47_s20, [#allocation6]  }
   0xf   :  { %s80_s25 = sshll.u32 %s4400_s5, 4  ;;  %s4239_s26 = smov [#allocation10]   ;;  %s81_s25 = int_to_ptr.hbm [resolvable:$true] %s80_s25 }
  0x10   :  { %s69_s27 = sshll.u32 %s4239_s26, 4  ;;  %s4240_s2 = smov [#allocation11]   ;;  %s70_s27 = int_to_ptr.vmem [resolvable:$true] %s69_s27 }
  0x11   :  { %75 = dma.hbm_to_vmem [thread:$0]  %s68_s23, 16384, %s70_s27, [#allocation9], %s4235_s11, %s4235_s11, %s4236_s12  }
  0x12   :  { %s82_s28 = sshll.u32 %s4240_s2, 4  ;;  %s4241_s29 = smov 64   ;;  %s83_s28 = int_to_ptr.vmem [resolvable:$true] %s82_s28 }
  0x13   :  { %s4242_s30 = smov 4  }
  0x14   :  { %88 = dma.hbm_to_vmem [thread:$0]  %s81_s25, 4096, %s83_s28, [#allocation12], %s4241_s29, %s4241_s29, %s4242_s30  }
  0x15   :  { %4223 = dma.done.wait [#allocation3], 32  }
  0x16   :  { %4224 = vsyncadd [#allocation3], 4294967264 }
  0x17   :  { %4225 = dma.done.wait [#allocation6], 512  }
  0x18   :  { %4226 = vsyncadd [#allocation6], 4294966784 }
  0x19   :  { %4227 = dma.done.wait [#allocation9], 32768  }
  0x1a   :  { %4228 = vsyncadd [#allocation9], 4294934528 }
  0x1b   :  { %4229 = dma.done.wait [#allocation12], 4096  }
  0x1c   :  { %4230 = vsyncadd [#allocation12], 4294963200  ;;  %v118_v0 = vld [vmem:[#allocation5] sm:$0xff]  ;;  %v119_v1 = vld [vmem:[#allocation5 + $0x8] sm:$0xff]  ;;  %vm147_vm0 = vcmask 1043456   ;;  %vm143_vm1 = vcmask 31744  }
  0x1d   :  { %136 = vst [vmem:[#allocation1] ss:$2 sm:$0xff] %v118_v0  ;;  %v2715_v2 = vld [vmem:[#allocation8 + $0xe0] sm:$0xf]  ;;  %v3783_v3 = vld [vmem:[#allocation8 + $0xec] sm:$0xf0] }
  0x1e   :  { %138 = vst [vmem:[#allocation1 + $0x10] ss:$2 sm:$0xff] %v119_v1  ;;  %v117_v4 = vld [vmem:[#allocation2] sm:$0x3]  ;;  %v2843_v5 = vld [vmem:[#allocation8 + $0x1e0] sm:$0xf]  ;;  %v2716_v17 = vor.u32 %v3783_v3, %v2715_v2 }
  0x1f   :  { %v3815_v6 = vld [vmem:[#allocation8 + $0x1ec] sm:$0xf0]  ;;  %v2971_v7 = vld [vmem:[#allocation8 + $0x2e0] sm:$0xf]  ;;  %s4243_s8 = smov [#allocation13]   ;;  %s2580_s12 = sshll.u32 %s4402_s7, 4  ;;  %s2581_s12 = int_to_ptr.hbm [resolvable:$true] %s2580_s12 }
  0x20   :  { %v3847_v8 = vld [vmem:[#allocation8 + $0x2ec] sm:$0xf0]  ;;  %v3099_v9 = vld [vmem:[#allocation8 + $0x3e0] sm:$0xf]  ;;  %v2844_v18 = vor.u32 %v3815_v6, %v2843_v5  ;;  %s2578_s9 = sshll.u32 %s4243_s8, 4  ;;  %s2579_s9 = int_to_ptr.vmem [resolvable:$true] %s2578_s9 }
  0x21   :  { %v3879_v10 = vld [vmem:[#allocation8 + $0x3ec] sm:$0xf0]  ;;  %v2699_v13 = vld [vmem:[#allocation8 + $0xc0] sm:$0xf]  ;;  %v2972_v21 = vor.u32 %v3847_v8, %v2971_v7 }
  0x22   :  { %v3779_v14 = vld [vmem:[#allocation8 + $0xcc] sm:$0xf0]  ;;  %v2827_v19 = vld [vmem:[#allocation8 + $0x1c0] sm:$0xf]  ;;  %v3100_v22 = vor.u32 %v3879_v10, %v3099_v9 }
  0x23   :  { %v3811_v20 = vld [vmem:[#allocation8 + $0x1cc] sm:$0xf0]  ;;  %v2955_v23 = vld [vmem:[#allocation8 + $0x2c0] sm:$0xf]  ;;  %v2700_v27 = vor.u32 %v3779_v14, %v2699_v13 }
  0x24   :  { %v139_v11 = vld.sshfl [vmem:[#allocation1] sm:$0xff pattern:$0x75316420]  ;;  %v140_v12 = vld.sshfl [vmem:[#allocation1 + $0x8] sm:$0xff pattern:$0x75316420]  ;;  %v2828_v28 = vor.u32 %v3811_v20, %v2827_v19 }
  0x25   :  { %2593 = vmatpush.msk.msra.mxu0 %vm147_vm0, %v139_v11  ;;  %2595 = vmatpush.msk.msra.mxu1 %vm147_vm0, %v140_v12  ;;  %v141_v15 = vld.sshfl [vmem:[#allocation1 + $0x10] sm:$0xff pattern:$0x75316420]  ;;  %v142_v16 = vld.sshfl [vmem:[#allocation1 + $0x18] sm:$0xff pattern:$0x75316420] }
  0x26   :  { %2597 = vmatpush.msk.msra.mxu2 %vm147_vm0, %v141_v15  ;;  %2599 = vmatpush.msk.msra.mxu3 %vm147_vm0, %v142_v16  ;;  %v3843_v24 = vld [vmem:[#allocation8 + $0x2cc] sm:$0xf0]  ;;  %v3083_v25 = vld [vmem:[#allocation8 + $0x3c0] sm:$0xf] }
  0x27   :  { %2594 = vmatmul.msk.f32.vlgmr.msra.gmra.mxu0 %vm143_vm1, %v117_v4  ;;  %2596 = vmatmul.msk.f32.vlgmr.msra.gmra.mxu1 %vm143_vm1, %v117_v4  ;;  %v3875_v26 = vld [vmem:[#allocation8 + $0x3cc] sm:$0xf0]  ;;  %v2683_v29 = vld [vmem:[#allocation8 + $0xa0] sm:$0xf]  ;;  %v2956_v33 = vor.u32 %v3843_v24, %v2955_v23 }
  0x28   :  { %2598 = vmatmul.msk.f32.vlgmr.msra.gmra.mxu2 %vm143_vm1, %v117_v4  ;;  %2600 = vmatmul.msk.f32.vlgmr.msra.gmra.mxu3 %vm143_vm1, %v117_v4  ;;  %v3775_v30 = vld [vmem:[#allocation8 + $0xac] sm:$0xf0]  ;;  %v2811_v31 = vld [vmem:[#allocation8 + $0x1a0] sm:$0xf]  ;;  %v3084_v34 = vor.u32 %v3875_v26, %v3083_v25 }
  0x29   :  { %1032 = vmatpush.bf16.msrb.mxu0 %v2716_v17  ;;  %1045 = vmatpush.bf16.msrb.mxu1 %v2844_v18  ;;  %v3807_v32 = vld [vmem:[#allocation8 + $0x1ac] sm:$0xf0]  ;;  %v2939_v35 = vld [vmem:[#allocation8 + $0x2a0] sm:$0xf]  ;;  %v2684_v39 = vor.u32 %v3775_v30, %v2683_v29  ;;  %v3781_v29 = vld [vmem:[#allocation8 + $0xe4] sm:$0xf] }
  0x2a   :  { %1058 = vmatpush.bf16.msrb.mxu2 %v2972_v21  ;;  %1071 = vmatpush.bf16.msrb.mxu3 %v3100_v22  ;;  %v3839_v36 = vld [vmem:[#allocation8 + $0x2ac] sm:$0xf0]  ;;  %v3067_v37 = vld [vmem:[#allocation8 + $0x3a0] sm:$0xf]  ;;  %v2812_v40 = vor.u32 %v3807_v32, %v2811_v31  ;;  %v2717_v30 = vld [vmem:[#allocation8 + $0xf0] sm:$0xf0] }
  0x2b   :  { %v3871_v38 = vld [vmem:[#allocation8 + $0x3ac] sm:$0xf0]  ;;  %v2667_v41 = vld [vmem:[#allocation8 + $0x80] sm:$0xf]  ;;  %v2940_v45 = vor.u32 %v3839_v36, %v2939_v35  ;;  %v3813_v31 = vld [vmem:[#allocation8 + $0x1e4] sm:$0xf] }
  0x2c   :  { %v3771_v42 = vld [vmem:[#allocation8 + $0x8c] sm:$0xf0]  ;;  %v2795_v43 = vld [vmem:[#allocation8 + $0x180] sm:$0xf]  ;;  %v3068_v46 = vor.u32 %v3871_v38, %v3067_v37 }
  0x2d   :  { %1033 = vmatpush.bf16.msrb.mxu0 %v2700_v27  ;;  %1046 = vmatpush.bf16.msrb.mxu1 %v2828_v28  ;;  %v3803_v44 = vld [vmem:[#allocation8 + $0x18c] sm:$0xf0]  ;;  %v2923_v47 = vld [vmem:[#allocation8 + $0x280] sm:$0xf]  ;;  %v2668_v51 = vor.u32 %v3771_v42, %v2667_v41  ;;  %v2973_v42 = vld [vmem:[#allocation8 + $0x2f0] sm:$0xf0] }
  0x2e   :  { %1059 = vmatpush.bf16.msrb.mxu2 %v2956_v33  ;;  %1072 = vmatpush.bf16.msrb.mxu3 %v3084_v34  ;;  %v3835_v48 = vld [vmem:[#allocation8 + $0x28c] sm:$0xf0]  ;;  %v3051_v49 = vld [vmem:[#allocation8 + $0x380] sm:$0xf]  ;;  %v2796_v52 = vor.u32 %v3803_v44, %v2795_v43  ;;  %v2845_v34 = vld [vmem:[#allocation8 + $0x1f0] sm:$0xf0] }
  0x2f   :  { %v3867_v50 = vld [vmem:[#allocation8 + $0x38c] sm:$0xf0]  ;;  %v2651_v53 = vld [vmem:[#allocation8 + $0x60] sm:$0xf]  ;;  %v2924_v57 = vor.u32 %v3835_v48, %v2923_v47  ;;  %v3877_v43 = vld [vmem:[#allocation8 + $0x3e4] sm:$0xf] }
  0x30   :  { %v3767_v54 = vld [vmem:[#allocation8 + $0x6c] sm:$0xf0]  ;;  %v2779_v55 = vld [vmem:[#allocation8 + $0x160] sm:$0xf]  ;;  %v3052_v58 = vor.u32 %v3867_v50, %v3051_v49  ;;  %v3101_v44 = vld [vmem:[#allocation8 + $0x3f0] sm:$0xf0] }
  0x31   :  { %1034 = vmatpush.bf16.msrb.mxu0 %v2684_v39  ;;  %1047 = vmatpush.bf16.msrb.mxu1 %v2812_v40  ;;  %v3799_v56 = vld [vmem:[#allocation8 + $0x16c] sm:$0xf0]  ;;  %v2907_v59 = vld [vmem:[#allocation8 + $0x260] sm:$0xf]  ;;  %v2652_v63 = vor.u32 %v3767_v54, %v2651_v53  ;;  %v3845_v39 = vld [vmem:[#allocation8 + $0x2e4] sm:$0xf]  ;;  %v3104_v54 = vor.u32 %v3877_v43, %v3101_v44 }
  0x32   :  { %1060 = vmatpush.bf16.msrb.mxu2 %v2940_v45  ;;  %1073 = vmatpush.bf16.msrb.mxu3 %v3068_v46  ;;  %v3831_v60 = vld [vmem:[#allocation8 + $0x26c] sm:$0xf0]  ;;  %v3035_v61 = vld [vmem:[#allocation8 + $0x360] sm:$0xf]  ;;  %v2780_v0 = vor.u32 %v3799_v56, %v2779_v55  ;;  %v2720_v45 = vor.u32 %v3781_v29, %v2717_v30  ;;  %v2848_v46 = vor.u32 %v3813_v31, %v2845_v34  ;;  %v3777_v47 = vld [vmem:[#allocation8 + $0xc4] sm:$0xf] }
  0x33   :  { %v3863_v62 = vld [vmem:[#allocation8 + $0x36c] sm:$0xf0]  ;;  %v2635_v1 = vld [vmem:[#allocation8 + $0x40] sm:$0xf]  ;;  %v2908_v5 = vor.u32 %v3831_v60, %v2907_v59  ;;  %v2701_v48 = vld [vmem:[#allocation8 + $0xd0] sm:$0xf0]  ;;  %v2976_v53 = vor.u32 %v3845_v39, %v2973_v42 }
  0x34   :  { %v3763_v2 = vld [vmem:[#allocation8 + $0x4c] sm:$0xf0]  ;;  %v2763_v3 = vld [vmem:[#allocation8 + $0x140] sm:$0xf]  ;;  %v3036_v6 = vor.u32 %v3863_v62, %v3035_v61  ;;  %v3809_v49 = vld [vmem:[#allocation8 + $0x1c4] sm:$0xf]  ;;  %v2704_v59 = vor.u32 %v3777_v47, %v2701_v48 }
  0x35   :  { %1035 = vmatpush.bf16.msrb.mxu0 %v2668_v51  ;;  %1048 = vmatpush.bf16.msrb.mxu1 %v2796_v52  ;;  %v3795_v4 = vld [vmem:[#allocation8 + $0x14c] sm:$0xf0]  ;;  %v2891_v7 = vld [vmem:[#allocation8 + $0x240] sm:$0xf]  ;;  %v2636_v11 = vor.u32 %v3763_v2, %v2635_v1  ;;  %v2829_v50 = vld [vmem:[#allocation8 + $0x1d0] sm:$0xf0] }
  0x36   :  { %1061 = vmatpush.bf16.msrb.mxu2 %v2924_v57  ;;  %1074 = vmatpush.bf16.msrb.mxu3 %v3052_v58  ;;  %v3827_v8 = vld [vmem:[#allocation8 + $0x24c] sm:$0xf0]  ;;  %v3019_v9 = vld [vmem:[#allocation8 + $0x340] sm:$0xf]  ;;  %v2764_v12 = vor.u32 %v3795_v4, %v2763_v3  ;;  %v3841_v55 = vld [vmem:[#allocation8 + $0x2c4] sm:$0xf]  ;;  %v2832_v60 = vor.u32 %v3809_v49, %v2829_v50 }
  0x37   :  { %v3859_v10 = vld [vmem:[#allocation8 + $0x34c] sm:$0xf0]  ;;  %v2619_v13 = vld [vmem:[#allocation8 + $0x20] sm:$0xf]  ;;  %v2892_v17 = vor.u32 %v3827_v8, %v2891_v7  ;;  %v2957_v56 = vld [vmem:[#allocation8 + $0x2d0] sm:$0xf0] }
  0x38   :  { %v3759_v14 = vld [vmem:[#allocation8 + $0x2c] sm:$0xf0]  ;;  %v2747_v15 = vld [vmem:[#allocation8 + $0x120] sm:$0xf]  ;;  %v3020_v18 = vor.u32 %v3859_v10, %v3019_v9  ;;  %v3873_v57 = vld [vmem:[#allocation8 + $0x3c4] sm:$0xf]  ;;  %v2960_v1 = vor.u32 %v3841_v55, %v2957_v56 }
  0x39   :  { %1036 = vmatpush.bf16.msrb.mxu0 %v2652_v63  ;;  %1049 = vmatpush.bf16.msrb.mxu1 %v2780_v0  ;;  %v3791_v16 = vld [vmem:[#allocation8 + $0x12c] sm:$0xf0]  ;;  %v2875_v19 = vld [vmem:[#allocation8 + $0x220] sm:$0xf]  ;;  %v2620_v24 = vor.u32 %v3759_v14, %v2619_v13  ;;  %v3085_v58 = vld [vmem:[#allocation8 + $0x3d0] sm:$0xf0] }
  0x3a   :  { %1062 = vmatpush.bf16.msrb.mxu2 %v2908_v5  ;;  %1075 = vmatpush.bf16.msrb.mxu3 %v3036_v6  ;;  %v3823_v20 = vld [vmem:[#allocation8 + $0x22c] sm:$0xf0]  ;;  %v3003_v21 = vld [vmem:[#allocation8 + $0x320] sm:$0xf]  ;;  %v2748_v25 = vor.u32 %v3791_v16, %v2747_v15  ;;  %v3773_v61 = vld [vmem:[#allocation8 + $0xa4] sm:$0xf]  ;;  %v3088_v2 = vor.u32 %v3873_v57, %v3085_v58 }
  0x3b   :  { %v3855_v22 = vld [vmem:[#allocation8 + $0x32c] sm:$0xf0]  ;;  %v2603_v23 = vld [vmem:[#allocation8] sm:$0xf]  ;;  %v2876_v32 = vor.u32 %v3823_v20, %v2875_v19  ;;  %v2685_v62 = vld [vmem:[#allocation8 + $0xb0] sm:$0xf0] }
  0x3c   :  { %v3755_v26 = vld [vmem:[#allocation8 + $0xc] sm:$0xf0]  ;;  %v2731_v27 = vld [vmem:[#allocation8 + $0x100] sm:$0xf]  ;;  %v3004_v33 = vor.u32 %v3855_v22, %v3003_v21  ;;  %v3805_v63 = vld [vmem:[#allocation8 + $0x1a4] sm:$0xf]  ;;  %v2688_v7 = vor.u32 %v3773_v61, %v2685_v62 }
  0x3d   :  { %1037 = vmatpush.bf16.msrb.mxu0 %v2636_v11  ;;  %1050 = vmatpush.bf16.msrb.mxu1 %v2764_v12  ;;  %v3787_v28 = vld [vmem:[#allocation8 + $0x10c] sm:$0xf0]  ;;  %v2859_v35 = vld [vmem:[#allocation8 + $0x200] sm:$0xf]  ;;  %v2604_v40 = vor.u32 %v3755_v26, %v2603_v23  ;;  %v2813_v0 = vld [vmem:[#allocation8 + $0x1b0] sm:$0xf0] }
  0x3e   :  { %1063 = vmatpush.bf16.msrb.mxu2 %v2892_v17  ;;  %1076 = vmatpush.bf16.msrb.mxu3 %v3020_v18  ;;  %v3819_v36 = vld [vmem:[#allocation8 + $0x20c] sm:$0xf0]  ;;  %v2987_v37 = vld [vmem:[#allocation8 + $0x300] sm:$0xf]  ;;  %v2732_v41 = vor.u32 %v3787_v28, %v2731_v27  ;;  %v3837_v3 = vld [vmem:[#allocation8 + $0x2a4] sm:$0xf]  ;;  %v2816_v8 = vor.u32 %v3805_v63, %v2813_v0 }
  0x3f   :  { %v3851_v38 = vld [vmem:[#allocation8 + $0x30c] sm:$0xf0]  ;;  %v2860_v51 = vor.u32 %v3819_v36, %v2859_v35  ;;  %v2941_v4 = vld [vmem:[#allocation8 + $0x2b0] sm:$0xf0]  ;;  %v3869_v5 = vld [vmem:[#allocation8 + $0x3a4] sm:$0xf] }
  0x40   :  { %v2988_v52 = vor.u32 %v3851_v38, %v2987_v37  ;;  %v3069_v6 = vld [vmem:[#allocation8 + $0x3b0] sm:$0xf0]  ;;  %v3769_v9 = vld [vmem:[#allocation8 + $0x84] sm:$0xf]  ;;  %v2944_v13 = vor.u32 %v3837_v3, %v2941_v4 }
  0x41   :  { %1038 = vmatpush.bf16.msrb.mxu0 %v2620_v24  ;;  %1051 = vmatpush.bf16.msrb.mxu1 %v2748_v25  ;;  %v2669_v10 = vld [vmem:[#allocation8 + $0x90] sm:$0xf0]  ;;  %v3801_v11 = vld [vmem:[#allocation8 + $0x184] sm:$0xf]  ;;  %v3072_v14 = vor.u32 %v3869_v5, %v3069_v6 }
  0x42   :  { %1064 = vmatpush.bf16.msrb.mxu2 %v2876_v32  ;;  %1077 = vmatpush.bf16.msrb.mxu3 %v3004_v33  ;;  %v2797_v12 = vld [vmem:[#allocation8 + $0x190] sm:$0xf0]  ;;  %v3833_v15 = vld [vmem:[#allocation8 + $0x284] sm:$0xf]  ;;  %v2672_v19 = vor.u32 %v3769_v9, %v2669_v10 }
  0x43   :  { %v2925_v16 = vld [vmem:[#allocation8 + $0x290] sm:$0xf0]  ;;  %v3865_v17 = vld [vmem:[#allocation8 + $0x384] sm:$0xf]  ;;  %v2800_v20 = vor.u32 %v3801_v11, %v2797_v12  ;;  %v116_v12 = vld [vmem:[#allocation7 + $0x8] sm:$0x77] }
  0x44   :  { %v3053_v18 = vld [vmem:[#allocation8 + $0x390] sm:$0xf0]  ;;  %v3765_v21 = vld [vmem:[#allocation8 + $0x64] sm:$0xf]  ;;  %v2928_v25 = vor.u32 %v3833_v15, %v2925_v16  ;;  %v124_v15 = vperm.slane %v116_v12, 0  ;;  %v125_v16 = vperm.slane %v116_v12, 4 }
  0x45   :  { %1039 = vmatpush.bf16.msrb.mxu0 %v2604_v40  ;;  %1052 = vmatpush.bf16.msrb.mxu1 %v2732_v41  ;;  %v2653_v22 = vld [vmem:[#allocation8 + $0x70] sm:$0xf0]  ;;  %v3797_v23 = vld [vmem:[#allocation8 + $0x164] sm:$0xf]  ;;  %v3056_v26 = vor.u32 %v3865_v17, %v3053_v18  ;;  %v3075_v12 = vld [vmem:[#allocation8 + $0x3a8] sm:$0xf] }
  0x46   :  { %1065 = vmatpush.bf16.msrb.mxu2 %v2860_v51  ;;  %1078 = vmatpush.bf16.msrb.mxu3 %v2988_v52  ;;  %v2781_v24 = vld [vmem:[#allocation8 + $0x170] sm:$0xf0]  ;;  %v2656_v27 = vor.u32 %v3765_v21, %v2653_v22  ;;  %v3761_v29 = vld [vmem:[#allocation8 + $0x44] sm:$0xf]  ;;  %v2851_v21 = vld [vmem:[#allocation8 + $0x1e8] sm:$0xf] }
  0x47   :  { %v2784_v28 = vor.u32 %v3797_v23, %v2781_v24  ;;  %v2637_v30 = vld [vmem:[#allocation8 + $0x50] sm:$0xf0]  ;;  %v3793_v31 = vld [vmem:[#allocation8 + $0x144] sm:$0xf]  ;;  %v3816_v22 = vld [vmem:[#allocation8 + $0x1f4] sm:$0xf0] }
  0x48   :  { %v2765_v32 = vld [vmem:[#allocation8 + $0x150] sm:$0xf0]  ;;  %v2640_v33 = vor.u32 %v3761_v29, %v2637_v30  ;;  %v3829_v35 = vld [vmem:[#allocation8 + $0x264] sm:$0xf]  ;;  %v2852_v30 = vor.u32 %v3816_v22, %v2851_v21  ;;  %v3836_v21 = vld [vmem:[#allocation8 + $0x294] sm:$0xf0] }
  0x49   :  { %1084 = vmatpush.bf16.msra.mxu0 %v2720_v45  ;;  %1097 = vmatpush.bf16.msra.mxu1 %v2848_v46  ;;  %v2768_v34 = vor.u32 %v3793_v31, %v2765_v32  ;;  %v2909_v36 = vld [vmem:[#allocation8 + $0x270] sm:$0xf0]  ;;  %v3861_v37 = vld [vmem:[#allocation8 + $0x364] sm:$0xf]  ;;  %v2707_v31 = vld [vmem:[#allocation8 + $0xc8] sm:$0xf] }
  0x4a   :  { %1110 = vmatpush.bf16.msra.mxu2 %v2976_v53  ;;  %1123 = vmatpush.bf16.msra.mxu3 %v3104_v54  ;;  %v2912_v38 = vor.u32 %v3829_v35, %v2909_v36  ;;  %v3037_v39 = vld [vmem:[#allocation8 + $0x370] sm:$0xf0]  ;;  %v3757_v41 = vld [vmem:[#allocation8 + $0x24] sm:$0xf]  ;;  %v2835_v35 = vld [vmem:[#allocation8 + $0x1c8] sm:$0xf] }
  0x4b   :  { %v3040_v40 = vor.u32 %v3861_v37, %v3037_v39  ;;  %v2621_v42 = vld [vmem:[#allocation8 + $0x30] sm:$0xf0]  ;;  %v3789_v43 = vld [vmem:[#allocation8 + $0x124] sm:$0xf]  ;;  %v3812_v36 = vld [vmem:[#allocation8 + $0x1d4] sm:$0xf0] }
  0x4c   :  { %v2624_v44 = vor.u32 %v3757_v41, %v2621_v42  ;;  %v2749_v45 = vld [vmem:[#allocation8 + $0x130] sm:$0xf0]  ;;  %v3825_v47 = vld [vmem:[#allocation8 + $0x244] sm:$0xf]  ;;  %v2979_v39 = vld [vmem:[#allocation8 + $0x2e8] sm:$0xf] }
  0x4d   :  { %1085 = vmatpush.bf16.msra.mxu0 %v2704_v59  ;;  %1098 = vmatpush.bf16.msra.mxu1 %v2832_v60  ;;  %v2752_v46 = vor.u32 %v3789_v43, %v2749_v45  ;;  %v2893_v48 = vld [vmem:[#allocation8 + $0x250] sm:$0xf0]  ;;  %v3857_v49 = vld [vmem:[#allocation8 + $0x344] sm:$0xf]  ;;  %v3107_v43 = vld [vmem:[#allocation8 + $0x3e8] sm:$0xf] }
  0x4e   :  { %1111 = vmatpush.bf16.msra.mxu2 %v2960_v1  ;;  %1124 = vmatpush.bf16.msra.mxu3 %v3088_v2  ;;  %v2896_v50 = vor.u32 %v3825_v47, %v2893_v48  ;;  %v3021_v51 = vld [vmem:[#allocation8 + $0x350] sm:$0xf0]  ;;  %v3753_v53 = vld [vmem:[#allocation8 + $0x4] sm:$0xf]  ;;  %v2691_v45 = vld [vmem:[#allocation8 + $0xa8] sm:$0xf]  ;;  %v2836_v47 = vor.u32 %v3812_v36, %v2835_v35 }
  0x4f   :  { %v3024_v52 = vor.u32 %v3857_v49, %v3021_v51  ;;  %v2605_v54 = vld [vmem:[#allocation8 + $0x10] sm:$0xf0]  ;;  %v3785_v56 = vld [vmem:[#allocation8 + $0x104] sm:$0xf]  ;;  %v3776_v48 = vld [vmem:[#allocation8 + $0xb4] sm:$0xf0] }
  0x50   :  { %v2608_v55 = vor.u32 %v3753_v53, %v2605_v54  ;;  %v2733_v57 = vld [vmem:[#allocation8 + $0x110] sm:$0xf0]  ;;  %v3821_v59 = vld [vmem:[#allocation8 + $0x224] sm:$0xf]  ;;  %v2819_v49 = vld [vmem:[#allocation8 + $0x1a8] sm:$0xf] }
  0x51   :  { %1086 = vmatpush.bf16.msra.mxu0 %v2688_v7  ;;  %1099 = vmatpush.bf16.msra.mxu1 %v2816_v8  ;;  %v2736_v58 = vor.u32 %v3785_v56, %v2733_v57  ;;  %v2877_v60 = vld [vmem:[#allocation8 + $0x230] sm:$0xf0]  ;;  %v3853_v62 = vld [vmem:[#allocation8 + $0x324] sm:$0xf]  ;;  %v2692_v57 = vor.u32 %v3776_v48, %v2691_v45  ;;  %v3059_v22 = vld [vmem:[#allocation8 + $0x388] sm:$0xf] }
  0x52   :  { %1112 = vmatpush.bf16.msra.mxu2 %v2944_v13  ;;  %1125 = vmatpush.bf16.msra.mxu3 %v3072_v14  ;;  %v2880_v61 = vor.u32 %v3821_v59, %v2877_v60  ;;  %v3005_v63 = vld [vmem:[#allocation8 + $0x330] sm:$0xf0]  ;;  %v3817_v1 = vld [vmem:[#allocation8 + $0x204] sm:$0xf]  ;;  %v3844_v59 = vld [vmem:[#allocation8 + $0x2d4] sm:$0xf0] }
  0x53   :  { %v3008_v0 = vor.u32 %v3853_v62, %v3005_v63  ;;  %v2861_v2 = vld [vmem:[#allocation8 + $0x210] sm:$0xf0]  ;;  %v3849_v4 = vld [vmem:[#allocation8 + $0x304] sm:$0xf]  ;;  %v3091_v63 = vld [vmem:[#allocation8 + $0x3c8] sm:$0xf] }
  0x54   :  { %v2864_v3 = vor.u32 %v3817_v1, %v2861_v2  ;;  %v2989_v5 = vld [vmem:[#allocation8 + $0x310] sm:$0xf0]  ;;  %v2675_v1 = vld [vmem:[#allocation8 + $0x88] sm:$0xf]  ;;  %v3772_v2 = vld [vmem:[#allocation8 + $0x94] sm:$0xf0] }
  0x55   :  { %1087 = vmatpush.bf16.msra.mxu0 %v2672_v19  ;;  %1100 = vmatpush.bf16.msra.mxu1 %v2800_v20  ;;  %v2992_v6 = vor.u32 %v3849_v4, %v2989_v5  ;;  %v4310_v7 = vld [vmem:[#allocation7] sm:$0x77]  ;;  %v2723_v19 = vld [vmem:[#allocation8 + $0xe8] sm:$0xf]  ;;  %v3784_v20 = vld [vmem:[#allocation8 + $0xf4] sm:$0xf0] }
  0x56   :  { %1113 = vmatpush.bf16.msra.mxu2 %v2928_v25  ;;  %1126 = vmatpush.bf16.msra.mxu3 %v3056_v26  ;;  %v122_v8 = vperm.slane %v4310_v7, 0  ;;  %v123_v9 = vperm.slane %v4310_v7, 4  ;;  %v132_v25 = vperm.slane %v124_v15, 0  ;;  %v133_v26 = vperm.slane %v125_v16, 0  ;;  %v3804_v4 = vld [vmem:[#allocation8 + $0x194] sm:$0xf0] }
  0x57   :  { %v2724_v29 = vor.u32 %v3784_v20, %v2723_v19  ;;  %v3768_v15 = vld [vmem:[#allocation8 + $0x74] sm:$0xf0]  ;;  %v2787_v16 = vld [vmem:[#allocation8 + $0x168] sm:$0xf] }
  0x58   :  { %v130_v10 = vperm.slane %v122_v8, 0  ;;  %v131_v11 = vperm.slane %v123_v9, 0  ;;  %v2947_v8 = vld [vmem:[#allocation8 + $0x2a8] sm:$0xf]  ;;  %v2676_v9 = vor.u32 %v3772_v2, %v2675_v1  ;;  %v3832_v35 = vld [vmem:[#allocation8 + $0x274] sm:$0xf0] }
  0x59   :  { %1088 = vmatpush.bf16.msra.mxu0 %v2656_v27  ;;  %1101 = vmatpush.bf16.msra.mxu1 %v2784_v28  ;;  %v2931_v20 = vld [vmem:[#allocation8 + $0x288] sm:$0xf]  ;;  %v3824_v1 = vld [vmem:[#allocation8 + $0x234] sm:$0xf0] }
  0x5a   :  { %1114 = vmatpush.bf16.msra.mxu2 %v2912_v38  ;;  %1127 = vmatpush.bf16.msra.mxu3 %v3040_v40  ;;  %v3848_v40 = vld [vmem:[#allocation8 + $0x2f4] sm:$0xf0]  ;;  %v3043_v36 = vld [vmem:[#allocation8 + $0x368] sm:$0xf] }
  0x5b   :  { %v2980_v53 = vor.u32 %v3848_v40, %v2979_v39  ;;  %v2627_v40 = vld [vmem:[#allocation8 + $0x28] sm:$0xf] }
  0x5c   :  { %v3027_v48 = vld [vmem:[#allocation8 + $0x348] sm:$0xf] }
  0x5d   :  { %1089 = vmatpush.bf16.msra.mxu0 %v2640_v33  ;;  %1102 = vmatpush.bf16.msra.mxu1 %v2768_v34  ;;  %v3780_v34 = vld [vmem:[#allocation8 + $0xd4] sm:$0xf0]  ;;  %v3011_v2 = vld [vmem:[#allocation8 + $0x328] sm:$0xf] }
  0x5e   :  { %1115 = vmatpush.bf16.msra.mxu2 %v2896_v50  ;;  %1128 = vmatpush.bf16.msra.mxu3 %v3024_v52  ;;  %v3808_v50 = vld [vmem:[#allocation8 + $0x1b4] sm:$0xf0] }
  0x5f   :  { %v2820_v62 = vor.u32 %v3808_v50, %v2819_v49  ;;  %v3860_v49 = vld [vmem:[#allocation8 + $0x354] sm:$0xf0] }
  0x61   :  { %1090 = vmatpush.bf16.msra.mxu0 %v2624_v44  ;;  %1103 = vmatpush.bf16.msra.mxu1 %v2752_v46  ;;  %v3880_v44 = vld [vmem:[#allocation8 + $0x3f4] sm:$0xf0]  ;;  %v2708_v46 = vor.u32 %v3780_v34, %v2707_v31  ;;  %v2915_v34 = vld [vmem:[#allocation8 + $0x268] sm:$0xf] }
  0x62   :  { %1116 = vmatpush.bf16.msra.mxu2 %v2880_v61  ;;  %1129 = vmatpush.bf16.msra.mxu3 %v3008_v0  ;;  %v3108_v56 = vor.u32 %v3880_v44, %v3107_v43  ;;  %v3876_v0 = vld [vmem:[#allocation8 + $0x3d4] sm:$0xf0]  ;;  %v2916_v44 = vor.u32 %v3832_v35, %v2915_v34  ;;  %v3842_v35 = vld [vmem:[#allocation8 + $0x2cc] sm:$0xf] }
  0x63   :  { %v3792_v43 = vld [vmem:[#allocation8 + $0x134] sm:$0xf0] }
  0x65   :  { %1091 = vmatpush.bf16.msra.mxu0 %v2608_v55  ;;  %1104 = vmatpush.bf16.msra.mxu1 %v2736_v58  ;;  %v2963_v58 = vld [vmem:[#allocation8 + $0x2c8] sm:$0xf] }
  0x66   :  { %1117 = vmatpush.bf16.msra.mxu2 %v2864_v3  ;;  %1130 = vmatpush.bf16.msra.mxu3 %v2992_v6  ;;  %v2803_v3 = vld [vmem:[#allocation8 + $0x188] sm:$0xf]  ;;  %v2964_v5 = vor.u32 %v3844_v59, %v2963_v58  ;;  %v3092_v6 = vor.u32 %v3876_v0, %v3091_v63  ;;  %v3028_v59 = vor.u32 %v3860_v49, %v3027_v48  ;;  %v2853_v63 = vld [vmem:[#allocation8 + $0x1f8] sm:$0xf0]  ;;  %v3870_v49 = vld [vmem:[#allocation8 + $0x3ac] sm:$0xf] }
  0x67   :  { %v2883_v0 = vld [vmem:[#allocation8 + $0x228] sm:$0xf]  ;;  %v2949_v48 = vld [vmem:[#allocation8 + $0x2b8] sm:$0xf0] }
  0xa4   :  { %v173_v13 = vpop.f32.mrf.mxu0  ;;  %v193_v14 = vpop.f32.mrf.mxu1 }
  0xa5   :  { %v174_v17 = vadd.f32 %v173_v13, %v130_v10  ;;  %v194_v18 = vadd.f32 %v193_v14, %v131_v11  ;;  %v2804_v10 = vor.u32 %v3804_v4, %v2803_v3  ;;  %v3840_v11 = vld [vmem:[#allocation8 + $0x2b4] sm:$0xf0]  ;;  %v2659_v14 = vld [vmem:[#allocation8 + $0x68] sm:$0xf] }
  0xa6   :  { %v3872_v13 = vld [vmem:[#allocation8 + $0x3b4] sm:$0xf0] }
  0xa7   :  { %vm236_vm2 = vcmp.ge.f32.partialorder %v174_v17, 0.0  ;;  %v240_v23 = vmul.f32 0.01, %v174_v17  ;;  %vm237_vm3 = vcmp.ge.f32.partialorder %v194_v18, 0.0  ;;  %v241_v24 = vmul.f32 0.01, %v194_v18 }
  0xa8   :  { %v3076_v19 = vor.u32 %v3872_v13, %v3075_v12  ;;  %v3856_v3 = vld [vmem:[#allocation8 + $0x334] sm:$0xf0]  ;;  %v2884_v12 = vor.u32 %v3824_v1, %v2883_v0  ;;  %v3061_v0 = vld [vmem:[#allocation8 + $0x398] sm:$0xf0] }
  0xa9   :  { %v244_v27 = vsel %vm236_vm2, %v174_v17, %v240_v23  ;;  %v245_v28 = vsel %vm237_vm3, %v194_v18, %v241_v24  ;;  %v3800_v17 = vld [vmem:[#allocation8 + $0x174] sm:$0xf0]  ;;  %v2948_v18 = vor.u32 %v3840_v11, %v2947_v8  ;;  %v2660_v24 = vor.u32 %v3768_v15, %v2659_v14  ;;  %v3810_v11 = vld [vmem:[#allocation8 + $0x1cc] sm:$0xf]  ;;  %v2837_v14 = vld [vmem:[#allocation8 + $0x1d8] sm:$0xf0] }
  0xaa   :  { %v4314_v32 = vpack.c.bf16 %v244_v27, %v244_v27  ;;  %v4316_v33 = vpack.c.bf16 %v245_v28, %v245_v28  ;;  %v3868_v23 = vld [vmem:[#allocation8 + $0x394] sm:$0xf0]  ;;  %v2771_v28 = vld [vmem:[#allocation8 + $0x148] sm:$0xf]  ;;  %v3012_v13 = vor.u32 %v3856_v3, %v3011_v2  ;;  %v3762_v3 = vld [vmem:[#allocation8 + $0x4c] sm:$0xf] }
  0xab   :  { %v213_v37 = vpop.f32.mrf.mxu2  ;;  %v233_v38 = vpop.f32.mrf.mxu3  ;;  %v3764_v27 = vld [vmem:[#allocation8 + $0x54] sm:$0xf0]  ;;  %v3060_v31 = vor.u32 %v3868_v23, %v3059_v22  ;;  %v2867_v15 = vld [vmem:[#allocation8 + $0x208] sm:$0xf]  ;;  %v3109_v22 = vld [vmem:[#allocation8 + $0x3f8] sm:$0xf0] }
  0xac   :  { %v214_v41 = vadd.f32 %v213_v37, %v132_v25  ;;  %v234_v42 = vadd.f32 %v233_v38, %v133_v26  ;;  %1040 = vmatmul.bf16.vlgmr.msrb.gmra.mxu0 %v4314_v32  ;;  %1053 = vmatmul.bf16.vlgmr.msrb.gmra.mxu1 %v4316_v33  ;;  %v2788_v25 = vor.u32 %v3800_v17, %v2787_v16  ;;  %v2643_v26 = vld [vmem:[#allocation8 + $0x48] sm:$0xf]  ;;  %v3864_v37 = vld [vmem:[#allocation8 + $0x374] sm:$0xf0] }
  0xad   :  { %1136 = vmatpush.bf16.msrb.mxu0 %v2724_v29  ;;  %1149 = vmatpush.bf16.msrb.mxu1 %v2852_v30  ;;  %v3796_v29 = vld [vmem:[#allocation8 + $0x154] sm:$0xf0]  ;;  %v2932_v30 = vor.u32 %v3836_v21, %v2931_v20  ;;  %v2644_v38 = vor.u32 %v3764_v27, %v2643_v26  ;;  %v3044_v45 = vor.u32 %v3864_v37, %v3043_v36  ;;  %v2995_v17 = vld [vmem:[#allocation8 + $0x308] sm:$0xf]  ;;  %v2981_v20 = vld [vmem:[#allocation8 + $0x2f8] sm:$0xf0] }
  0xae   :  { %vm238_vm4 = vcmp.ge.f32.partialorder %v214_v41, 0.0  ;;  %v242_v51 = vmul.f32 0.01, %v214_v41  ;;  %vm239_vm5 = vcmp.ge.f32.partialorder %v234_v42, 0.0  ;;  %v243_v52 = vmul.f32 0.01, %v234_v42 }
  0xaf   :  { %v2772_v39 = vor.u32 %v3796_v29, %v2771_v28  ;;  %v3820_v16 = vld [vmem:[#allocation8 + $0x214] sm:$0xf0]  ;;  %v3878_v21 = vld [vmem:[#allocation8 + $0x3ec] sm:$0xf]  ;;  %v2693_v28 = vld [vmem:[#allocation8 + $0xb8] sm:$0xf0] }
  0xb0   :  { %v246_v54 = vsel %vm238_vm4, %v214_v41, %v242_v51  ;;  %v247_v55 = vsel %vm239_vm5, %v234_v42, %v243_v52  ;;  %v3760_v41 = vld [vmem:[#allocation8 + $0x34] sm:$0xf0]  ;;  %v2755_v42 = vld [vmem:[#allocation8 + $0x128] sm:$0xf]  ;;  %v2868_v26 = vor.u32 %v3820_v16, %v2867_v15  ;;  %v3806_v29 = vld [vmem:[#allocation8 + $0x1ac] sm:$0xf]  ;;  %v3112_v34 = vor.u32 %v3878_v21, %v3109_v22 }
  0xb1   :  { %v4320_v60 = vpack.c.bf16 %v246_v54, %v246_v54  ;;  %v4322_v61 = vpack.c.bf16 %v247_v55, %v247_v55  ;;  %1137 = vmatpush.bf16.msrb.mxu0 %v2708_v46  ;;  %1150 = vmatpush.bf16.msrb.mxu1 %v2836_v47  ;;  %v2899_v46 = vld [vmem:[#allocation8 + $0x248] sm:$0xf]  ;;  %v3828_v47 = vld [vmem:[#allocation8 + $0x254] sm:$0xf0]  ;;  %v2628_v50 = vor.u32 %v3760_v41, %v2627_v40  ;;  %v2965_v36 = vld [vmem:[#allocation8 + $0x2d8] sm:$0xf0] }
  0xb2   :  { %v2756_v51 = vor.u32 %v3792_v43, %v2755_v42  ;;  %v2611_v52 = vld [vmem:[#allocation8 + $0x8] sm:$0xf]  ;;  %v3788_v55 = vld [vmem:[#allocation8 + $0x114] sm:$0xf0]  ;;  %v2900_v58 = vor.u32 %v3828_v47, %v2899_v46  ;;  %v3874_v37 = vld [vmem:[#allocation8 + $0x3cc] sm:$0xf] }
  0xb3   :  { %1066 = vmatmul.bf16.vlgmr.msrb.gmra.mxu2 %v4320_v60  ;;  %1079 = vmatmul.bf16.vlgmr.msrb.gmra.mxu3 %v4322_v61  ;;  %v2739_v54 = vld [vmem:[#allocation8 + $0x108] sm:$0xf]  ;;  %v3770_v41 = vld [vmem:[#allocation8 + $0x8c] sm:$0xf]  ;;  %v2677_v42 = vld [vmem:[#allocation8 + $0x98] sm:$0xf0] }
  0xb4   :  { %1162 = vmatpush.bf16.msrb.mxu2 %v2980_v53  ;;  %1175 = vmatpush.bf16.msrb.mxu3 %v3108_v56  ;;  %v3756_v53 = vld [vmem:[#allocation8 + $0x14] sm:$0xf0]  ;;  %v3782_v56 = vld [vmem:[#allocation8 + $0xec] sm:$0xf] }
  0xb5   :  { %1138 = vmatpush.bf16.msrb.mxu0 %v2692_v57  ;;  %1151 = vmatpush.bf16.msrb.mxu1 %v2820_v62  ;;  %v2725_v57 = vld [vmem:[#allocation8 + $0xf8] sm:$0xf0]  ;;  %v3814_v62 = vld [vmem:[#allocation8 + $0x1ec] sm:$0xf]  ;;  %v2612_v4 = vor.u32 %v3756_v53, %v2611_v52 }
  0xb6   :  { %v2856_v8 = vor.u32 %v3814_v62, %v2853_v63  ;;  %v3802_v43 = vld [vmem:[#allocation8 + $0x18c] sm:$0xf]  ;;  %v2933_v62 = vld [vmem:[#allocation8 + $0x298] sm:$0xf0] }
  0xb7   :  { %v3838_v47 = vld [vmem:[#allocation8 + $0x2ac] sm:$0xf] }
  0xb8   :  { %1163 = vmatpush.bf16.msrb.mxu2 %v2964_v5  ;;  %1176 = vmatpush.bf16.msrb.mxu3 %v3092_v6  ;;  %v2740_v5 = vor.u32 %v3788_v55, %v2739_v54  ;;  %v2728_v6 = vor.u32 %v3782_v56, %v2725_v57  ;;  %v3766_v53 = vld [vmem:[#allocation8 + $0x6c] sm:$0xf]  ;;  %v2661_v54 = vld [vmem:[#allocation8 + $0x78] sm:$0xf0]  ;;  %v2952_v57 = vor.u32 %v3838_v47, %v2949_v48  ;;  %v3211_v48 = vld [vmem:[#allocation10 + $0xc0] sm:$0xf] }
  0xb9   :  { %1139 = vmatpush.bf16.msrb.mxu0 %v2676_v9  ;;  %1152 = vmatpush.bf16.msrb.mxu1 %v2804_v10  ;;  %v3778_v9 = vld [vmem:[#allocation8 + $0xcc] sm:$0xf]  ;;  %v2709_v10 = vld [vmem:[#allocation8 + $0xd8] sm:$0xf0]  ;;  %v2664_v1 = vor.u32 %v3766_v53, %v2661_v54  ;;  %v3339_v53 = vld [vmem:[#allocation10 + $0x1c0] sm:$0xf] }
  0xba   :  { %v2712_v23 = vor.u32 %v3778_v9, %v2709_v10  ;;  %v3798_v55 = vld [vmem:[#allocation8 + $0x16c] sm:$0xf]  ;;  %v2789_v56 = vld [vmem:[#allocation8 + $0x178] sm:$0xf0]  ;;  %v3939_v54 = vld [vmem:[#allocation10 + $0x1cc] sm:$0xf0] }
  0xbb   :  { %v3866_v63 = vld [vmem:[#allocation8 + $0x38c] sm:$0xf]  ;;  %v2792_v2 = vor.u32 %v3798_v55, %v2789_v56  ;;  %v2869_v55 = vld [vmem:[#allocation8 + $0x218] sm:$0xf0] }
  0xbc   :  { %1164 = vmatpush.bf16.msrb.mxu2 %v2948_v18  ;;  %1177 = vmatpush.bf16.msrb.mxu3 %v3076_v19  ;;  %v3852_v18 = vld [vmem:[#allocation8 + $0x314] sm:$0xf0]  ;;  %v3846_v19 = vld [vmem:[#allocation8 + $0x2ec] sm:$0xf]  ;;  %v3064_v9 = vor.u32 %v3866_v63, %v3061_v0  ;;  %v3340_v63 = vor.u32 %v3939_v54, %v3339_v53  ;;  %v3243_v53 = vld [vmem:[#allocation10 + $0x100] sm:$0xf] }
  0xbd   :  { %1092 = vmatmul.bf16.vlgmr.msra.gmra.mxu0 %v4314_v32  ;;  %1105 = vmatmul.bf16.vlgmr.msra.gmra.mxu1 %v4316_v33  ;;  %v2996_v27 = vor.u32 %v3852_v18, %v2995_v17  ;;  %v3830_v10 = vld [vmem:[#allocation8 + $0x26c] sm:$0xf]  ;;  %v2629_v17 = vld [vmem:[#allocation8 + $0x38] sm:$0xf0]  ;;  %v3915_v54 = vld [vmem:[#allocation10 + $0x10c] sm:$0xf0] }
  0xbe   :  { %1140 = vmatpush.bf16.msrb.mxu0 %v2660_v24  ;;  %1153 = vmatpush.bf16.msrb.mxu1 %v2788_v25  ;;  %v2840_v24 = vor.u32 %v3810_v11, %v2837_v14  ;;  %v3774_v25 = vld [vmem:[#allocation8 + $0xac] sm:$0xf]  ;;  %v2917_v11 = vld [vmem:[#allocation8 + $0x278] sm:$0xf0] }
  0xbf   :  { %v3758_v16 = vld [vmem:[#allocation8 + $0x2c] sm:$0xf] }
  0xc0   :  { %1165 = vmatpush.bf16.msrb.mxu2 %v2932_v30  ;;  %1178 = vmatpush.bf16.msrb.mxu3 %v3060_v31  ;;  %v2821_v30 = vld [vmem:[#allocation8 + $0x1b8] sm:$0xf0]  ;;  %v2984_v31 = vor.u32 %v3846_v19, %v2981_v20  ;;  %v3790_v18 = vld [vmem:[#allocation8 + $0x12c] sm:$0xf]  ;;  %v2920_v20 = vor.u32 %v3830_v10, %v2917_v11  ;;  %v3899_v11 = vld [vmem:[#allocation10 + $0x8c] sm:$0xf0] }
  0xc1   :  { %v2824_v40 = vor.u32 %v3806_v29, %v2821_v30  ;;  %v2757_v19 = vld [vmem:[#allocation8 + $0x138] sm:$0xf0]  ;;  %v3826_v22 = vld [vmem:[#allocation8 + $0x24c] sm:$0xf] }
  0xc2   :  { %1141 = vmatpush.bf16.msrb.mxu0 %v2644_v38  ;;  %1154 = vmatpush.bf16.msrb.mxu1 %v2772_v39  ;;  %v3093_v38 = vld [vmem:[#allocation8 + $0x3d8] sm:$0xf0]  ;;  %v2696_v39 = vor.u32 %v3774_v25, %v2693_v28  ;;  %v3754_v28 = vld [vmem:[#allocation8 + $0xc] sm:$0xf] }
  0xc3   :  { %1118 = vmatmul.bf16.vlgmr.msra.gmra.mxu2 %v4320_v60  ;;  %1131 = vmatmul.bf16.vlgmr.msra.gmra.mxu3 %v4322_v61  ;;  %v3096_v46 = vor.u32 %v3874_v37, %v3093_v38  ;;  %v3029_v25 = vld [vmem:[#allocation8 + $0x358] sm:$0xf0]  ;;  %v3786_v30 = vld [vmem:[#allocation8 + $0x10c] sm:$0xf]  ;;  %v3911_v38 = vld [vmem:[#allocation10 + $0xec] sm:$0xf0] }
  0xc4   :  { %1166 = vmatpush.bf16.msrb.mxu2 %v2916_v44  ;;  %1179 = vmatpush.bf16.msrb.mxu3 %v3044_v45  ;;  %v2805_v44 = vld [vmem:[#allocation8 + $0x198] sm:$0xf0]  ;;  %v2968_v45 = vor.u32 %v3842_v35, %v2965_v36  ;;  %v3227_v35 = vld [vmem:[#allocation10 + $0xe0] sm:$0xf]  ;;  %v3850_v56 = vld [vmem:[#allocation8 + $0x30c] sm:$0xf] }
  0xc5   :  { %v2808_v52 = vor.u32 %v3802_v43, %v2805_v44  ;;  %v2613_v29 = vld [vmem:[#allocation8 + $0x18] sm:$0xf0]  ;;  %v3228_v47 = vor.u32 %v3911_v38, %v3227_v35  ;;  %v3275_v35 = vld [vmem:[#allocation10 + $0x140] sm:$0xf] }
  0xc6   :  { %1142 = vmatpush.bf16.msrb.mxu0 %v2628_v50  ;;  %1155 = vmatpush.bf16.msrb.mxu1 %v2756_v51  ;;  %v3077_v50 = vld [vmem:[#allocation8 + $0x3b8] sm:$0xf0]  ;;  %v2680_v51 = vor.u32 %v3770_v41, %v2677_v42  ;;  %v3854_v42 = vld [vmem:[#allocation8 + $0x32c] sm:$0xf]  ;;  %v2616_v44 = vor.u32 %v3754_v28, %v2613_v29 }
  0xc7   :  { %v2885_v41 = vld [vmem:[#allocation8 + $0x238] sm:$0xf0] }
  0xc8   :  { %1167 = vmatpush.bf16.msrb.mxu2 %v2900_v58  ;;  %1180 = vmatpush.bf16.msrb.mxu3 %v3028_v59  ;;  %v3080_v58 = vor.u32 %v3870_v49, %v3077_v50  ;;  %v3834_v59 = vld [vmem:[#allocation8 + $0x28c] sm:$0xf]  ;;  %v3013_v43 = vld [vmem:[#allocation8 + $0x338] sm:$0xf0] }
  0xca   :  { %1143 = vmatpush.bf16.msrb.mxu0 %v2612_v4  ;;  %1156 = vmatpush.bf16.msrb.mxu1 %v2740_v5  ;;  %v2645_v4 = vld [vmem:[#allocation8 + $0x58] sm:$0xf0]  ;;  %v3794_v5 = vld [vmem:[#allocation8 + $0x14c] sm:$0xf] }
  0xcb   :  { %v2648_v14 = vor.u32 %v3762_v3, %v2645_v4  ;;  %v3903_v3 = vld [vmem:[#allocation10 + $0xac] sm:$0xf0]  ;;  %v3323_v4 = vld [vmem:[#allocation10 + $0x1a0] sm:$0xf] }
  0xcc   :  { %1168 = vmatpush.bf16.msrb.mxu2 %v2884_v12  ;;  %1181 = vmatpush.bf16.msrb.mxu3 %v3012_v13  ;;  %v3862_v12 = vld [vmem:[#allocation8 + $0x36c] sm:$0xf]  ;;  %v3045_v13 = vld [vmem:[#allocation8 + $0x378] sm:$0xf0] }
  0xcd   :  { %1144 = vmatmul.bf16.vlgmr.msrb.gmra.mxu0 %v4314_v32  ;;  %1157 = vmatmul.bf16.vlgmr.msrb.gmra.mxu1 %v4316_v33  ;;  %v3048_v21 = vor.u32 %v3862_v12, %v3045_v13  ;;  %v3307_v12 = vld [vmem:[#allocation10 + $0x180] sm:$0xf]  ;;  %v3931_v13 = vld [vmem:[#allocation10 + $0x18c] sm:$0xf0] }
  0xce   :  { %1188 = vmatpush.bf16.msra.mxu0 %v2728_v6  ;;  %1201 = vmatpush.bf16.msra.mxu1 %v2856_v8  ;;  %v2773_v6 = vld [vmem:[#allocation8 + $0x158] sm:$0xf0]  ;;  %v2936_v8 = vor.u32 %v3834_v59, %v2933_v62  ;;  %v3975_v59 = vld [vmem:[#allocation10 + $0x2ec] sm:$0xf0] }
  0xcf   :  { %v2776_v15 = vor.u32 %v3794_v5, %v2773_v6  ;;  %v3935_v5 = vld [vmem:[#allocation10 + $0x1ac] sm:$0xf0] }
  0xd0   :  { %1169 = vmatpush.bf16.msrb.mxu2 %v2868_v26  ;;  %1182 = vmatpush.bf16.msrb.mxu3 %v2996_v27  ;;  %v2632_v26 = vor.u32 %v3758_v16, %v2629_v17  ;;  %v2760_v27 = vor.u32 %v3790_v18, %v2757_v19  ;;  %v3324_v10 = vor.u32 %v3935_v5, %v3323_v4  ;;  %v3291_v16 = vld [vmem:[#allocation10 + $0x160] sm:$0xf]  ;;  %v3927_v17 = vld [vmem:[#allocation10 + $0x16c] sm:$0xf0] }
  0xd1   :  { %v3292_v19 = vor.u32 %v3927_v17, %v3291_v16  ;;  %v3959_v4 = vld [vmem:[#allocation10 + $0x26c] sm:$0xf0]  ;;  %v3933_v16 = vld [vmem:[#allocation10 + $0x1a4] sm:$0xf] }
  0xd2   :  { %1189 = vmatpush.bf16.msra.mxu0 %v2712_v23  ;;  %1202 = vmatpush.bf16.msra.mxu1 %v2840_v24  ;;  %v2901_v23 = vld [vmem:[#allocation8 + $0x258] sm:$0xf0]  ;;  %v3858_v24 = vld [vmem:[#allocation8 + $0x34c] sm:$0xf] }
  0xd3   :  { %1170 = vmatmul.bf16.vlgmr.msrb.gmra.mxu2 %v4320_v60  ;;  %1183 = vmatmul.bf16.vlgmr.msrb.gmra.mxu3 %v4322_v61  ;;  %v2904_v36 = vor.u32 %v3826_v22, %v2901_v23  ;;  %v3032_v37 = vor.u32 %v3858_v24, %v3029_v25  ;;  %v3887_v23 = vld [vmem:[#allocation10 + $0x2c] sm:$0xf0]  ;;  %v3115_v24 = vld [vmem:[#allocation10] sm:$0xf] }
  0xd4   :  { %1214 = vmatpush.bf16.msra.mxu2 %v2984_v31  ;;  %1227 = vmatpush.bf16.msra.mxu3 %v3112_v34  ;;  %v2741_v31 = vld [vmem:[#allocation8 + $0x118] sm:$0xf0]  ;;  %v3822_v34 = vld [vmem:[#allocation8 + $0x22c] sm:$0xf]  ;;  %v3883_v25 = vld [vmem:[#allocation10 + $0xc] sm:$0xf0] }
  0xd5   :  { %v2888_v50 = vor.u32 %v3822_v34, %v2885_v41  ;;  %v3116_v28 = vor.u32 %v3883_v25, %v3115_v24  ;;  %v3197_v41 = vld [vmem:[#allocation10 + $0xb0] sm:$0xf0] }
  0xd6   :  { %1190 = vmatpush.bf16.msra.mxu0 %v2696_v39  ;;  %1203 = vmatpush.bf16.msra.mxu1 %v2824_v40  ;;  %v3355_v39 = vld [vmem:[#allocation10 + $0x1e0] sm:$0xf]  ;;  %v3943_v40 = vld [vmem:[#allocation10 + $0x1ec] sm:$0xf0]  ;;  %v3309_v25 = vld [vmem:[#allocation10 + $0x190] sm:$0xf0] }
  0xd7   :  { %v3356_v49 = vor.u32 %v3943_v40, %v3355_v39  ;;  %v3971_v39 = vld [vmem:[#allocation10 + $0x2cc] sm:$0xf0]  ;;  %v3901_v40 = vld [vmem:[#allocation10 + $0xa4] sm:$0xf] }
  0xd8   :  { %1215 = vmatpush.bf16.msra.mxu2 %v2968_v45  ;;  %1228 = vmatpush.bf16.msra.mxu3 %v3096_v46  ;;  %v2744_v45 = vor.u32 %v3786_v30, %v2741_v31  ;;  %v3818_v46 = vld [vmem:[#allocation8 + $0x20c] sm:$0xf]  ;;  %v3905_v30 = vld [vmem:[#allocation10 + $0xc4] sm:$0xf]  ;;  %v3213_v31 = vld [vmem:[#allocation10 + $0xd0] sm:$0xf0] }
  0xd9   :  { %v2872_v0 = vor.u32 %v3818_v46, %v2869_v55  ;;  %v3216_v34 = vor.u32 %v3905_v30, %v3213_v31  ;;  %v3451_v46 = vld [vmem:[#allocation10 + $0x2a0] sm:$0xf]  ;;  %v4007_v31 = vld [vmem:[#allocation10 + $0x3ec] sm:$0xf0] }
  0xda   :  { %1191 = vmatpush.bf16.msra.mxu0 %v2680_v51  ;;  %1204 = vmatpush.bf16.msra.mxu1 %v2808_v52  ;;  %v3016_v51 = vor.u32 %v3854_v42, %v3013_v43  ;;  %v3907_v52 = vld [vmem:[#allocation10 + $0xcc] sm:$0xf0]  ;;  %v3200_v43 = vor.u32 %v3901_v40, %v3197_v41  ;;  %v3435_v55 = vld [vmem:[#allocation10 + $0x280] sm:$0xf] }
  0xdb   :  { %v3212_v62 = vor.u32 %v3907_v52, %v3211_v48  ;;  %v3967_v48 = vld [vmem:[#allocation10 + $0x2ac] sm:$0xf0]  ;;  %v3595_v41 = vld [vmem:[#allocation10 + $0x3c0] sm:$0xf] }
  0xdc   :  { %1216 = vmatpush.bf16.msra.mxu2 %v2952_v57  ;;  %1229 = vmatpush.bf16.msra.mxu3 %v3080_v58  ;;  %v2997_v57 = vld [vmem:[#allocation8 + $0x318] sm:$0xf0]  ;;  %v3483_v58 = vld [vmem:[#allocation10 + $0x2e0] sm:$0xf] }
  0xdd   :  { %v3484_v6 = vor.u32 %v3975_v59, %v3483_v58  ;;  %v3893_v58 = vld [vmem:[#allocation10 + $0x64] sm:$0xf]  ;;  %v3165_v59 = vld [vmem:[#allocation10 + $0x70] sm:$0xf0] }
  0xde   :  { %1192 = vmatpush.bf16.msra.mxu0 %v2664_v1  ;;  %1205 = vmatpush.bf16.msra.mxu1 %v2792_v2  ;;  %v3000_v1 = vor.u32 %v3850_v56, %v2997_v57  ;;  %v3195_v2 = vld [vmem:[#allocation10 + $0xa0] sm:$0xf]  ;;  %v3244_v56 = vor.u32 %v3915_v54, %v3243_v53  ;;  %v3963_v57 = vld [vmem:[#allocation10 + $0x28c] sm:$0xf0] }
  0xe0   :  { %1217 = vmatpush.bf16.msra.mxu2 %v2936_v8  ;;  %1230 = vmatpush.bf16.msra.mxu3 %v3064_v9  ;;  %v3196_v8 = vor.u32 %v3903_v3, %v3195_v2  ;;  %v3179_v9 = vld [vmem:[#allocation10 + $0x80] sm:$0xf] }
  0xe1   :  { %v3419_v3 = vld [vmem:[#allocation10 + $0x260] sm:$0xf] }
  0xe2   :  { %1193 = vmatpush.bf16.msra.mxu0 %v2648_v14  ;;  %1206 = vmatpush.bf16.msra.mxu1 %v2776_v15  ;;  %v3308_v14 = vor.u32 %v3931_v13, %v3307_v12  ;;  %v3895_v15 = vld [vmem:[#allocation10 + $0x6c] sm:$0xf0]  ;;  %v3420_v5 = vor.u32 %v3959_v4, %v3419_v3  ;;  %v3403_v13 = vld [vmem:[#allocation10 + $0x240] sm:$0xf]  ;;  %v3913_v3 = vld [vmem:[#allocation10 + $0x104] sm:$0xf] }
  0xe3   :  { %v3245_v4 = vld [vmem:[#allocation10 + $0x110] sm:$0xf0] }
  0xe4   :  { %1218 = vmatpush.bf16.msra.mxu2 %v2920_v20  ;;  %1231 = vmatpush.bf16.msra.mxu3 %v3048_v21  ;;  %v3147_v20 = vld [vmem:[#allocation10 + $0x40] sm:$0xf]  ;;  %v3891_v21 = vld [vmem:[#allocation10 + $0x4c] sm:$0xf0] }
  0xe5   :  { %v3148_v22 = vor.u32 %v3891_v21, %v3147_v20  ;;  %v3387_v20 = vld [vmem:[#allocation10 + $0x220] sm:$0xf]  ;;  %v3951_v21 = vld [vmem:[#allocation10 + $0x22c] sm:$0xf0] }
  0xe6   :  { %1194 = vmatpush.bf16.msra.mxu0 %v2632_v26  ;;  %1207 = vmatpush.bf16.msra.mxu1 %v2760_v27  ;;  %v3909_v26 = vld [vmem:[#allocation10 + $0xe4] sm:$0xf]  ;;  %v3229_v27 = vld [vmem:[#allocation10 + $0xf0] sm:$0xf0] }
  0xe7   :  { %v3232_v29 = vor.u32 %v3909_v26, %v3229_v27  ;;  %v3371_v27 = vld [vmem:[#allocation10 + $0x200] sm:$0xf] }
  0xe8   :  { %1219 = vmatpush.bf16.msra.mxu2 %v2904_v36  ;;  %1232 = vmatpush.bf16.msra.mxu3 %v3032_v37  ;;  %v3923_v36 = vld [vmem:[#allocation10 + $0x14c] sm:$0xf0]  ;;  %v3467_v37 = vld [vmem:[#allocation10 + $0x2c0] sm:$0xf] }
  0xe9   :  { %v3276_v38 = vor.u32 %v3923_v36, %v3275_v35  ;;  %v3468_v42 = vor.u32 %v3971_v39, %v3467_v37  ;;  %v3293_v35 = vld [vmem:[#allocation10 + $0x170] sm:$0xf0] }
  0xea   :  { %1195 = vmatpush.bf16.msra.mxu0 %v2616_v44  ;;  %1208 = vmatpush.bf16.msra.mxu1 %v2744_v45  ;;  %v3259_v44 = vld [vmem:[#allocation10 + $0x120] sm:$0xf]  ;;  %v3919_v45 = vld [vmem:[#allocation10 + $0x12c] sm:$0xf0]  ;;  %v3485_v39 = vld [vmem:[#allocation10 + $0x2f0] sm:$0xf0] }
  0xec   :  { %1220 = vmatpush.bf16.msra.mxu2 %v2888_v50  ;;  %1233 = vmatpush.bf16.msra.mxu3 %v3016_v51  ;;  %v3181_v50 = vld [vmem:[#allocation10 + $0x90] sm:$0xf0]  ;;  %v3452_v51 = vor.u32 %v3967_v48, %v3451_v46  ;;  %v3969_v46 = vld [vmem:[#allocation10 + $0x2c4] sm:$0xf] }
  0xed   :  { %1196 = vmatmul.bf16.vlgmr.msra.gmra.mxu0 %v4314_v32  ;;  %1209 = vmatmul.bf16.vlgmr.msra.gmra.mxu1 %v4316_v33  ;;  %v3180_v32 = vor.u32 %v3899_v11, %v3179_v9  ;;  %v3163_v33 = vld [vmem:[#allocation10 + $0x60] sm:$0xf]  ;;  %v3937_v9 = vld [vmem:[#allocation10 + $0x1c4] sm:$0xf]  ;;  %v3341_v11 = vld [vmem:[#allocation10 + $0x1d0] sm:$0xf0] }
  0xee   :  { %2036 = vmatpush.bf16.msrb.mxu0 %v3228_v47  ;;  %2049 = vmatpush.bf16.msrb.mxu1 %v3356_v49  ;;  %v3164_v18 = vor.u32 %v3895_v15, %v3163_v33  ;;  %v3260_v47 = vor.u32 %v3919_v45, %v3259_v44  ;;  %v3897_v49 = vld [vmem:[#allocation10 + $0x84] sm:$0xf]  ;;  %v3344_v12 = vor.u32 %v3937_v9, %v3341_v11  ;;  %v3133_v15 = vld [vmem:[#allocation10 + $0x30] sm:$0xf0]  ;;  %v3991_v11 = vld [vmem:[#allocation10 + $0x36c] sm:$0xf0] }
  0xef   :  { %v3184_v52 = vor.u32 %v3897_v49, %v3181_v50  ;;  %v3921_v44 = vld [vmem:[#allocation10 + $0x144] sm:$0xf]  ;;  %v3277_v45 = vld [vmem:[#allocation10 + $0x150] sm:$0xf0]  ;;  %v380_v50 = vperm.slane %v4310_v7, 1 }
  0xf0   :  { %1221 = vmatpush.bf16.msra.mxu2 %v2872_v0  ;;  %1234 = vmatpush.bf16.msra.mxu3 %v3000_v1  ;;  %v3941_v0 = vld [vmem:[#allocation10 + $0x1e4] sm:$0xf]  ;;  %v3357_v1 = vld [vmem:[#allocation10 + $0x1f0] sm:$0xf0] }
  0xf1   :  { %v3360_v2 = vor.u32 %v3941_v0, %v3357_v1  ;;  %v3469_v48 = vld [vmem:[#allocation10 + $0x2d0] sm:$0xf0]  ;;  %v388_v0 = vperm.slane %v380_v50, 1  ;;  %v3563_v1 = vld [vmem:[#allocation10 + $0x380] sm:$0xf] }
  0xf2   :  { %2037 = vmatpush.bf16.msrb.mxu0 %v3212_v62  ;;  %2050 = vmatpush.bf16.msrb.mxu1 %v3340_v63  ;;  %v3436_v62 = vor.u32 %v3963_v57, %v3435_v55  ;;  %v3168_v63 = vor.u32 %v3893_v58, %v3165_v59  ;;  %v3472_v49 = vor.u32 %v3969_v46, %v3469_v48  ;;  %v3261_v57 = vld [vmem:[#allocation10 + $0x130] sm:$0xf0]  ;;  %v3965_v58 = vld [vmem:[#allocation10 + $0x2a4] sm:$0xf]  ;;  %v3979_v46 = vld [vmem:[#allocation10 + $0x30c] sm:$0xf0] }
  0xf3   :  { %1222 = vmatmul.bf16.vlgmr.msra.gmra.mxu2 %v4320_v60  ;;  %1235 = vmatmul.bf16.vlgmr.msra.gmra.mxu3 %v4322_v61  ;;  %v3131_v60 = vld [vmem:[#allocation10 + $0x20] sm:$0xf]  ;;  %v3373_v48 = vld [vmem:[#allocation10 + $0x210] sm:$0xf0] }
  0xf4   :  { %2062 = vmatpush.bf16.msrb.mxu2 %v3484_v6  ;;  %v3132_v61 = vor.u32 %v3887_v23, %v3131_v60  ;;  %v3889_v6 = vld [vmem:[#allocation10 + $0x44] sm:$0xf]  ;;  %v3117_v23 = vld [vmem:[#allocation10 + $0x10] sm:$0xf0] }
  0xf5   :  { %v3881_v60 = vld [vmem:[#allocation10 + $0x4] sm:$0xf] }
  0xf6   :  { %2038 = vmatpush.bf16.msrb.mxu0 %v3196_v8  ;;  %2051 = vmatpush.bf16.msrb.mxu1 %v3324_v10  ;;  %v3149_v8 = vld [vmem:[#allocation10 + $0x50] sm:$0xf0]  ;;  %v3120_v24 = vor.u32 %v3881_v60, %v3117_v23 }
  0xf7   :  { %v3152_v10 = vor.u32 %v3889_v6, %v3149_v8  ;;  %v3248_v6 = vor.u32 %v3913_v3, %v3245_v4  ;;  %v3437_v8 = vld [vmem:[#allocation10 + $0x290] sm:$0xf0] }
  0xf8   :  { %2063 = vmatpush.bf16.msrb.mxu2 %v3468_v42  ;;  %v4003_v42 = vld [vmem:[#allocation10 + $0x3cc] sm:$0xf0] }
  0xfa   :  { %2039 = vmatpush.bf16.msrb.mxu0 %v3180_v32  ;;  %2052 = vmatpush.bf16.msrb.mxu1 %v3308_v14  ;;  %v3955_v32 = vld [vmem:[#allocation10 + $0x24c] sm:$0xf0]  ;;  %v3885_v14 = vld [vmem:[#allocation10 + $0x24] sm:$0xf] }
  0xfb   :  { %v3404_v33 = vor.u32 %v3955_v32, %v3403_v13  ;;  %v3136_v17 = vor.u32 %v3885_v14, %v3133_v15  ;;  %v3957_v14 = vld [vmem:[#allocation10 + $0x264] sm:$0xf]  ;;  %v3421_v15 = vld [vmem:[#allocation10 + $0x270] sm:$0xf0] }
  0xfc   :  { %2064 = vmatpush.bf16.msrb.mxu2 %v3452_v51  ;;  %v3579_v51 = vld [vmem:[#allocation10 + $0x3a0] sm:$0xf] }
  0xfe   :  { %2040 = vmatpush.bf16.msrb.mxu0 %v3164_v18  ;;  %2053 = vmatpush.bf16.msrb.mxu1 %v3292_v19  ;;  %v3325_v18 = vld [vmem:[#allocation10 + $0x1b0] sm:$0xf0] }
  0xff   :  { %v3328_v19 = vor.u32 %v3933_v16, %v3325_v18  ;;  %v3424_v16 = vor.u32 %v3957_v14, %v3421_v15  ;;  %v3987_v18 = vld [vmem:[#allocation10 + $0x34c] sm:$0xf0] }
 0x100   :  { %2065 = vmatpush.bf16.msrb.mxu2 %v3436_v62  ;;  %v3453_v62 = vld [vmem:[#allocation10 + $0x2b0] sm:$0xf0] }
 0x102   :  { %2041 = vmatpush.bf16.msrb.mxu0 %v3148_v22  ;;  %2054 = vmatpush.bf16.msrb.mxu1 %v3276_v38  ;;  %v3388_v22 = vor.u32 %v3951_v21, %v3387_v20  ;;  %v3973_v38 = vld [vmem:[#allocation10 + $0x2e4] sm:$0xf] }
 0x103   :  { %v3488_v40 = vor.u32 %v3973_v38, %v3485_v39  ;;  %v3953_v21 = vld [vmem:[#allocation10 + $0x244] sm:$0xf]  ;;  %v3912_v38 = vld [vmem:[#allocation10 + $0xf4] sm:$0xf0] }
 0x104   :  { %2066 = vmatpush.bf16.msrb.mxu2 %v3420_v5  ;;  %v3961_v5 = vld [vmem:[#allocation10 + $0x284] sm:$0xf] }
 0x105   :  { %v3440_v9 = vor.u32 %v3961_v5, %v3437_v8 }
 0x106   :  { %2042 = vmatpush.bf16.msrb.mxu0 %v3132_v61  ;;  %2055 = vmatpush.bf16.msrb.mxu1 %v3260_v47  ;;  %v3929_v61 = vld [vmem:[#allocation10 + $0x184] sm:$0xf]  ;;  %v3280_v47 = vor.u32 %v3921_v44, %v3277_v45 }
 0x107   :  { %v3312_v26 = vor.u32 %v3929_v61, %v3309_v25  ;;  %v4339_v25 = vld [vmem:[#allocation7] sm:$0x77] }
 0x108   :  { %2067 = vmatpush.bf16.msrb.mxu2 %v3404_v33 }
 0x10a   :  { %2043 = vmatpush.bf16.msrb.mxu0 %v3116_v28  ;;  %2056 = vmatpush.bf16.msrb.mxu1 %v3244_v56  ;;  %v3947_v28 = vld [vmem:[#allocation10 + $0x20c] sm:$0xf0]  ;;  %v3917_v56 = vld [vmem:[#allocation10 + $0x124] sm:$0xf] }
 0x10b   :  { %v3372_v30 = vor.u32 %v3947_v28, %v3371_v27  ;;  %v3264_v59 = vor.u32 %v3917_v56, %v3261_v57  ;;  %v3515_v27 = vld [vmem:[#allocation10 + $0x320] sm:$0xf]  ;;  %v3983_v28 = vld [vmem:[#allocation10 + $0x32c] sm:$0xf0]  ;;  %v3613_v56 = vld [vmem:[#allocation10 + $0x3f0] sm:$0xf0] }
 0x10c   :  { %2068 = vmatpush.bf16.msrb.mxu2 %v3388_v22  ;;  %v3405_v22 = vld [vmem:[#allocation10 + $0x250] sm:$0xf0] }
 0x10d   :  { %v3408_v61 = vor.u32 %v3953_v21, %v3405_v22  ;;  %v3944_v22 = vld [vmem:[#allocation10 + $0x1f4] sm:$0xf0] }
 0x10e   :  { %2088 = vmatpush.bf16.msra.mxu0 %v3232_v29  ;;  %2101 = vmatpush.bf16.msra.mxu1 %v3360_v2  ;;  %v3611_v29 = vld [vmem:[#allocation10 + $0x3e0] sm:$0xf]  ;;  %v3995_v2 = vld [vmem:[#allocation10 + $0x38c] sm:$0xf0] }
 0x10f   :  { %v3612_v36 = vor.u32 %v4007_v31, %v3611_v29  ;;  %v3564_v7 = vor.u32 %v3995_v2, %v3563_v1  ;;  %v3949_v31 = vld [vmem:[#allocation10 + $0x224] sm:$0xf]  ;;  %v3904_v1 = vld [vmem:[#allocation10 + $0xb4] sm:$0xf0] }
 0x110   :  { %2069 = vmatpush.bf16.msrb.mxu2 %v3372_v30  ;;  %v3516_v30 = vor.u32 %v3983_v28, %v3515_v27  ;;  %v4001_v2 = vld [vmem:[#allocation10 + $0x3c4] sm:$0xf] }
 0x111   :  { %2075 = vmatpush.bf16.msrb.mxu3 %v3612_v36 }
 0x112   :  { %2089 = vmatpush.bf16.msra.mxu0 %v3216_v34  ;;  %2102 = vmatpush.bf16.msra.mxu1 %v3344_v12  ;;  %v3925_v34 = vld [vmem:[#allocation10 + $0x164] sm:$0xf] }
 0x113   :  { %v3296_v37 = vor.u32 %v3925_v34, %v3293_v35  ;;  %v3389_v34 = vld [vmem:[#allocation10 + $0x230] sm:$0xf0] }
 0x114   :  { %2114 = vmatpush.bf16.msra.mxu2 %v3488_v40  ;;  %v3392_v39 = vor.u32 %v3949_v31, %v3389_v34  ;;  %v3892_v31 = vld [vmem:[#allocation10 + $0x54] sm:$0xf0]  ;;  %v3347_v34 = vld [vmem:[#allocation10 + $0x1c8] sm:$0xf] }
 0x116   :  { %2090 = vmatpush.bf16.msra.mxu0 %v3200_v43  ;;  %2103 = vmatpush.bf16.msra.mxu1 %v3328_v19  ;;  %v3596_v43 = vor.u32 %v4003_v42, %v3595_v41  ;;  %v3219_v42 = vld [vmem:[#allocation10 + $0xc8] sm:$0xf] }
 0x118   :  { %2076 = vmatpush.bf16.msrb.mxu3 %v3596_v43  ;;  %2115 = vmatpush.bf16.msra.mxu2 %v3472_v49  ;;  %v3499_v43 = vld [vmem:[#allocation10 + $0x300] sm:$0xf] }
 0x11a   :  { %2091 = vmatpush.bf16.msra.mxu0 %v3184_v52  ;;  %2104 = vmatpush.bf16.msra.mxu1 %v3312_v26  ;;  %v3999_v52 = vld [vmem:[#allocation10 + $0x3ac] sm:$0xf0]  ;;  %v381_v26 = vperm.slane %v4339_v25, 5 }
 0x11b   :  { %v3580_v55 = vor.u32 %v3999_v52, %v3579_v51  ;;  %v3908_v52 = vld [vmem:[#allocation10 + $0xd4] sm:$0xf0] }
 0x11c   :  { %v389_v41 = vperm.slane %v381_v26, 1 }
 0x11d   :  { %2077 = vmatpush.bf16.msrb.mxu3 %v3580_v55  ;;  %v4005_v55 = vld [vmem:[#allocation10 + $0x3e4] sm:$0xf] }
 0x11e   :  { %2092 = vmatpush.bf16.msra.mxu0 %v3168_v63  ;;  %2105 = vmatpush.bf16.msra.mxu1 %v3296_v37  ;;  %v3456_v63 = vor.u32 %v3965_v58, %v3453_v62  ;;  %v3235_v37 = vld [vmem:[#allocation10 + $0xe8] sm:$0xf]  ;;  %v3616_v57 = vor.u32 %v4005_v55, %v3613_v56 }
 0x11f   :  { %v3236_v45 = vor.u32 %v3912_v38, %v3235_v37  ;;  %v3203_v62 = vld [vmem:[#allocation10 + $0xa8] sm:$0xf]  ;;  %v3940_v38 = vld [vmem:[#allocation10 + $0x1d4] sm:$0xf0] }
 0x120   :  { %2116 = vmatpush.bf16.msra.mxu2 %v3456_v63  ;;  %v3204_v5 = vor.u32 %v3904_v1, %v3203_v62  ;;  %v3517_v1 = vld [vmem:[#allocation10 + $0x330] sm:$0xf0] }
 0x121   :  { %2078 = vmatpush.bf16.msrb.mxu3 %v3564_v7  ;;  %v3597_v7 = vld [vmem:[#allocation10 + $0x3d0] sm:$0xf0] }
 0x122   :  { %2093 = vmatpush.bf16.msra.mxu0 %v3152_v10  ;;  %2106 = vmatpush.bf16.msra.mxu1 %v3280_v47  ;;  %v3547_v10 = vld [vmem:[#allocation10 + $0x360] sm:$0xf]  ;;  %v3945_v47 = vld [vmem:[#allocation10 + $0x204] sm:$0xf]  ;;  %v3600_v3 = vor.u32 %v4001_v2, %v3597_v7 }
 0x123   :  { %v3548_v33 = vor.u32 %v3991_v11, %v3547_v10  ;;  %v3900_v10 = vld [vmem:[#allocation10 + $0x94] sm:$0xf0]  ;;  %v3997_v11 = vld [vmem:[#allocation10 + $0x3a4] sm:$0xf] }
 0x124   :  { %2117 = vmatpush.bf16.msra.mxu2 %v3440_v9 }
 0x125   :  { %2079 = vmatpush.bf16.msrb.mxu3 %v3548_v33  ;;  %v4345_v33 = vld [vmem:[#allocation7 + $0x8] sm:$0x77] }
 0x126   :  { %2094 = vmatpush.bf16.msra.mxu0 %v3136_v17  ;;  %2107 = vmatpush.bf16.msra.mxu1 %v3264_v59  ;;  %v3531_v17 = vld [vmem:[#allocation10 + $0x340] sm:$0xf]  ;;  %v3220_v59 = vor.u32 %v3908_v52, %v3219_v42  ;;  %v382_v14 = vperm.slane %v4345_v33, 1  ;;  %v3985_v52 = vld [vmem:[#allocation10 + $0x344] sm:$0xf] }
 0x127   :  { %v3532_v20 = vor.u32 %v3987_v18, %v3531_v17  ;;  %v3171_v17 = vld [vmem:[#allocation10 + $0x68] sm:$0xf]  ;;  %v3896_v18 = vld [vmem:[#allocation10 + $0x74] sm:$0xf0] }
 0x128   :  { %2118 = vmatpush.bf16.msra.mxu2 %v3424_v16  ;;  %v390_v26 = vperm.slane %v382_v14, 1  ;;  %v3172_v28 = vor.u32 %v3896_v18, %v3171_v17  ;;  %v3977_v14 = vld [vmem:[#allocation10 + $0x304] sm:$0xf]  ;;  %v3906_v17 = vld [vmem:[#allocation10 + $0xcc] sm:$0xf] }
 0x129   :  { %v1041_v53 = vpop.f32.mrf.mxu0  ;;  %v1054_v54 = vpop.f32.mrf.mxu1  ;;  %2080 = vmatpush.bf16.msrb.mxu3 %v3532_v20  ;;  %v3221_v18 = vld [vmem:[#allocation10 + $0xd8] sm:$0xf0] }
 0x12a   :  { %2095 = vmatpush.bf16.msra.mxu0 %v3120_v24  ;;  %v1042_v12 = vadd.f32 %v1041_v53, %v388_v0  ;;  %2108 = vmatpush.bf16.msra.mxu1 %v3248_v6  ;;  %v3500_v53 = vor.u32 %v3979_v46, %v3499_v43  ;;  %v3187_v6 = vld [vmem:[#allocation10 + $0x88] sm:$0xf]  ;;  %v3348_v43 = vor.u32 %v3940_v38, %v3347_v34  ;;  %v3205_v34 = vld [vmem:[#allocation10 + $0xb8] sm:$0xf0] }
 0x12b   :  { %v3188_v16 = vor.u32 %v3900_v10, %v3187_v6  ;;  %v3331_v46 = vld [vmem:[#allocation10 + $0x1a8] sm:$0xf] }
 0x12c   :  { %v1055_v19 = vadd.f32 %v1054_v54, %v1042_v12  ;;  %2119 = vmatpush.bf16.msra.mxu2 %v3408_v61  ;;  %v3376_v54 = vor.u32 %v3945_v47, %v3373_v48  ;;  %v3581_v12 = vld [vmem:[#allocation10 + $0x3b0] sm:$0xf0]  ;;  %v3299_v10 = vld [vmem:[#allocation10 + $0x168] sm:$0xf] }
 0x12d   :  { %2081 = vmatpush.bf16.msrb.mxu3 %v3516_v30  ;;  %v3155_v30 = vld [vmem:[#allocation10 + $0x48] sm:$0xf] }
 0x12e   :  { %v3156_v42 = vor.u32 %v3892_v31, %v3155_v30  ;;  %v3972_v30 = vld [vmem:[#allocation10 + $0x2d4] sm:$0xf0]  ;;  %v3902_v31 = vld [vmem:[#allocation10 + $0xac] sm:$0xf] }
 0x12f   :  { %v3208_v38 = vor.u32 %v3902_v31, %v3205_v34  ;;  %v3930_v31 = vld [vmem:[#allocation10 + $0x18c] sm:$0xf]  ;;  %v3317_v34 = vld [vmem:[#allocation10 + $0x198] sm:$0xf0] }
 0x130   :  { %2120 = vmatpush.bf16.msra.mxu2 %v3392_v39  ;;  %v3989_v39 = vld [vmem:[#allocation10 + $0x364] sm:$0xf] }
 0x131   :  { %v1043_v13 = vpop.f32.mrf.mxu0  ;;  %v1056_v32 = vpop.f32.mrf.mxu1  ;;  %2082 = vmatpush.bf16.msrb.mxu3 %v3500_v53  ;;  %v3533_v53 = vld [vmem:[#allocation10 + $0x350] sm:$0xf0] }
 0x132   :  { %v3584_v32 = vor.u32 %v3997_v11, %v3581_v12  ;;  %v3928_v11 = vld [vmem:[#allocation10 + $0x174] sm:$0xf0] }
 0x134   :  { %2121 = vmatpush.bf16.msra.mxu2 %v3376_v54  ;;  %v3536_v54 = vor.u32 %v3985_v52, %v3533_v53  ;;  %v3443_v52 = vld [vmem:[#allocation10 + $0x288] sm:$0xf] }
 0x135   :  { %2127 = vmatpush.bf16.msra.mxu3 %v3616_v57  ;;  %v3123_v57 = vld [vmem:[#allocation10 + $0x8] sm:$0xf] }
 0x136   :  { %v1067_v60 = vpop.f32.mrf.mxu2  ;;  %v1080_v23 = vpop.f32.mrf.mxu3 }
 0x137   :  { %v1068_v24 = vadd.f32 %v1067_v60, %v1055_v19  ;;  %v3363_v19 = vld [vmem:[#allocation10 + $0x1e8] sm:$0xf]  ;;  %v3993_v60 = vld [vmem:[#allocation10 + $0x384] sm:$0xf] }
 0x139   :  { %v1081_v29 = vadd.f32 %v1080_v23, %v1068_v24  ;;  %2128 = vmatpush.bf16.msra.mxu3 %v3600_v3  ;;  %v3565_v23 = vld [vmem:[#allocation10 + $0x390] sm:$0xf0]  ;;  %v3910_v3 = vld [vmem:[#allocation10 + $0xec] sm:$0xf] }
 0x13a   :  { %v1093_v35 = vpop.f32.mrf.mxu0  ;;  %v1106_v36 = vpop.f32.mrf.mxu1  ;;  %v3568_v24 = vor.u32 %v3993_v60, %v3565_v23  ;;  %v3224_v23 = vor.u32 %v3906_v17, %v3221_v18  ;;  %v3141_v17 = vld [vmem:[#allocation10 + $0x38] sm:$0xf0]  ;;  %v3934_v18 = vld [vmem:[#allocation10 + $0x1ac] sm:$0xf] }
 0x13b   :  { %vm1240_vm6 = vcmp.ge.f32.partialorder %v1081_v29, 0.0  ;;  %v1244_v40 = vmul.f32 0.01, %v1081_v29  ;;  %v1094_v58 = vadd.f32 %v1093_v35, %v389_v41 }
 0x13d   :  { %v1248_v44 = vsel %vm1240_vm6, %v1081_v29, %v1244_v40  ;;  %v1107_v4 = vadd.f32 %v1106_v36, %v1094_v58  ;;  %2129 = vmatpush.bf16.msra.mxu3 %v3584_v32  ;;  %v3364_v29 = vor.u32 %v3944_v22, %v3363_v19  ;;  %v3549_v40 = vld [vmem:[#allocation10 + $0x370] sm:$0xf0]  ;;  %v3884_v58 = vld [vmem:[#allocation10 + $0x14] sm:$0xf0]  ;;  %v3491_v32 = vld [vmem:[#allocation10 + $0x2e8] sm:$0xf] }
 0x13e   :  { %v4342_v49 = vpack.c.bf16 %v1248_v44, %v1248_v44  ;;  %v1069_v50 = vpop.f32.mrf.mxu2  ;;  %v1082_v51 = vpop.f32.mrf.mxu3  ;;  %v3552_v41 = vor.u32 %v3989_v39, %v3549_v40  ;;  %v3139_v44 = vld [vmem:[#allocation10 + $0x28] sm:$0xf]  ;;  %v3920_v40 = vld [vmem:[#allocation10 + $0x134] sm:$0xf0] }
 0x13f   :  { %v3936_v51 = vld [vmem:[#allocation10 + $0x1b4] sm:$0xf0]  ;;  %v3267_v39 = vld [vmem:[#allocation10 + $0x128] sm:$0xf] }
 0x140   :  { %2044 = vmatmul.bf16.vlgmr.msrb.gmra.mxu0 %v4342_v49  ;;  %v3332_v56 = vor.u32 %v3936_v51, %v3331_v46  ;;  %v3268_v46 = vor.u32 %v3920_v40, %v3267_v39  ;;  %v3916_v51 = vld [vmem:[#allocation10 + $0x114] sm:$0xf0] }
 0x141   :  { %2140 = vmatpush.bf16.msrb.mxu0 %v3236_v45  ;;  %2130 = vmatpush.bf16.msra.mxu3 %v3568_v24  ;;  %v3888_v45 = vld [vmem:[#allocation10 + $0x34] sm:$0xf0] }
 0x142   :  { %v1095_v63 = vpop.f32.mrf.mxu0  ;;  %v1108_v0 = vpop.f32.mrf.mxu1  ;;  %v3140_v55 = vor.u32 %v3888_v45, %v3139_v44  ;;  %v3924_v24 = vld [vmem:[#allocation10 + $0x154] sm:$0xf0]  ;;  %v3189_v44 = vld [vmem:[#allocation10 + $0x98] sm:$0xf0]  ;;  %v383_v45 = vperm.slane %v4345_v33, 5 }
 0x143   :  { %v3932_v63 = vld [vmem:[#allocation10 + $0x194] sm:$0xf0]  ;;  %v3981_v0 = vld [vmem:[#allocation10 + $0x324] sm:$0xf] }
 0x144   :  { %v3948_v40 = vld [vmem:[#allocation10 + $0x214] sm:$0xf0] }
 0x145   :  { %2141 = vmatpush.bf16.msrb.mxu0 %v3220_v59  ;;  %2131 = vmatpush.bf16.msra.mxu3 %v3552_v41  ;;  %v3315_v59 = vld [vmem:[#allocation10 + $0x188] sm:$0xf] }
 0x146   :  { %v1119_v8 = vpop.f32.mrf.mxu2  ;;  %v1132_v9 = vpop.f32.mrf.mxu3  ;;  %v3459_v41 = vld [vmem:[#allocation10 + $0x2a8] sm:$0xf] }
 0x147   :  { %v1120_v13 = vadd.f32 %v1119_v8, %v1107_v4  ;;  %v3237_v4 = vld [vmem:[#allocation10 + $0xf8] sm:$0xf0]  ;;  %v3124_v8 = vor.u32 %v3884_v58, %v3123_v57  ;;  %v3942_v58 = vld [vmem:[#allocation10 + $0x1ec] sm:$0xf] }
 0x148   :  { %v3173_v57 = vld [vmem:[#allocation10 + $0x78] sm:$0xf0] }
 0x149   :  { %v1133_v15 = vadd.f32 %v1132_v9, %v1120_v13  ;;  %2142 = vmatpush.bf16.msrb.mxu0 %v3204_v5  ;;  %2132 = vmatpush.bf16.msra.mxu3 %v3536_v54  ;;  %v3520_v5 = vor.u32 %v3981_v0, %v3517_v1  ;;  %v3316_v9 = vor.u32 %v3932_v63, %v3315_v59  ;;  %v3365_v59 = vld [vmem:[#allocation10 + $0x1f8] sm:$0xf0]  ;;  %v391_v63 = vperm.slane %v383_v45, 1 }
 0x14a   :  { %v1145_v20 = vpop.f32.mrf.mxu0  ;;  %v1158_v21 = vpop.f32.mrf.mxu1  ;;  %v3240_v13 = vor.u32 %v3910_v3, %v3237_v4  ;;  %v3960_v3 = vld [vmem:[#allocation10 + $0x274] sm:$0xf0]  ;;  %v3890_v4 = vld [vmem:[#allocation10 + $0x4c] sm:$0xf]  ;;  %v3301_v45 = vld [vmem:[#allocation10 + $0x178] sm:$0xf0] }
 0x14b   :  { %vm1241_vm7 = vcmp.ge.f32.partialorder %v1133_v15, 0.0  ;;  %v1245_v61 = vmul.f32 0.01, %v1133_v15  ;;  %v1146_v47 = vadd.f32 %v1145_v20, %v390_v26  ;;  %v3475_v26 = vld [vmem:[#allocation10 + $0x2c8] sm:$0xf] }
 0x14d   :  { %v1249_v27 = vsel %vm1241_vm7, %v1133_v15, %v1245_v61  ;;  %2143 = vmatpush.bf16.msrb.mxu0 %v3188_v16  ;;  %v1159_v62 = vadd.f32 %v1158_v21, %v1146_v47  ;;  %2133 = vmatpush.bf16.msra.mxu3 %v3520_v5  ;;  %v3501_v15 = vld [vmem:[#allocation10 + $0x310] sm:$0xf0]  ;;  %v3976_v16 = vld [vmem:[#allocation10 + $0x2f4] sm:$0xf0]  ;;  %v3300_v21 = vor.u32 %v3928_v11, %v3299_v10  ;;  %v3283_v61 = vld [vmem:[#allocation10 + $0x148] sm:$0xf] }
 0x14e   :  { %v4348_v35 = vpack.c.bf16 %v1249_v27, %v1249_v27  ;;  %v1121_v36 = vpop.f32.mrf.mxu2  ;;  %v1134_v37 = vpop.f32.mrf.mxu3  ;;  %v3504_v19 = vor.u32 %v3977_v14, %v3501_v15  ;;  %v3492_v60 = vor.u32 %v3976_v16, %v3491_v32  ;;  %v3157_v5 = vld [vmem:[#allocation10 + $0x58] sm:$0xf0]  ;;  %v3956_v15 = vld [vmem:[#allocation10 + $0x254] sm:$0xf0]  ;;  %v3886_v16 = vld [vmem:[#allocation10 + $0x2c] sm:$0xf] }
 0x14f   :  { %v3284_v36 = vor.u32 %v3924_v24, %v3283_v61  ;;  %v3476_v37 = vor.u32 %v3972_v30, %v3475_v26  ;;  %v3160_v11 = vor.u32 %v3890_v4, %v3157_v5  ;;  %v3952_v26 = vld [vmem:[#allocation10 + $0x234] sm:$0xf0]  ;;  %v3587_v4 = vld [vmem:[#allocation10 + $0x3a8] sm:$0xf] }
 0x150   :  { %2057 = vmatmul.bf16.vlgmr.msrb.gmra.mxu1 %v4348_v35  ;;  %2096 = vmatmul.bf16.vlgmr.msra.gmra.mxu0 %v4342_v49  ;;  %v4000_v5 = vld [vmem:[#allocation10 + $0x3b4] sm:$0xf0] }
 0x151   :  { %2144 = vmatpush.bf16.msrb.mxu0 %v3172_v28  ;;  %2153 = vmatpush.bf16.msrb.mxu1 %v3364_v29 }
 0x152   :  { %v1147_v48 = vpop.f32.mrf.mxu0  ;;  %v1160_v50 = vpop.f32.mrf.mxu1  ;;  %2134 = vmatpush.bf16.msra.mxu3 %v3504_v19  ;;  %v3333_v19 = vld [vmem:[#allocation10 + $0x1b8] sm:$0xf0] }
 0x153   :  { %v3251_v50 = vld [vmem:[#allocation10 + $0x108] sm:$0xf]  ;;  %v3336_v24 = vor.u32 %v3934_v18, %v3333_v19 }
 0x155   :  { %2145 = vmatpush.bf16.msrb.mxu0 %v3156_v42  ;;  %2154 = vmatpush.bf16.msrb.mxu1 %v3348_v43  ;;  %v3968_v42 = vld [vmem:[#allocation10 + $0x2b4] sm:$0xf0]  ;;  %v3898_v43 = vld [vmem:[#allocation10 + $0x8c] sm:$0xf] }
 0x156   :  { %v1171_v2 = vpop.f32.mrf.mxu2  ;;  %v1184_v7 = vpop.f32.mrf.mxu3  ;;  %v3460_v47 = vor.u32 %v3968_v42, %v3459_v41  ;;  %v3192_v48 = vor.u32 %v3898_v43, %v3189_v44  ;;  %v3619_v41 = vld [vmem:[#allocation10 + $0x3e8] sm:$0xf]  ;;  %v4008_v42 = vld [vmem:[#allocation10 + $0x3f4] sm:$0xf0]  ;;  %v3320_v43 = vor.u32 %v3930_v31, %v3317_v34  ;;  %v3926_v44 = vld [vmem:[#allocation10 + $0x16c] sm:$0xf] }
 0x157   :  { %v1172_v6 = vadd.f32 %v1171_v2, %v1159_v62  ;;  %v3252_v62 = vor.u32 %v3916_v51, %v3251_v50  ;;  %v3427_v2 = vld [vmem:[#allocation10 + $0x268] sm:$0xf] }
 0x158   :  { %v3428_v10 = vor.u32 %v3960_v3, %v3427_v2 }
 0x159   :  { %2146 = vmatpush.bf16.msrb.mxu0 %v3140_v55  ;;  %2155 = vmatpush.bf16.msrb.mxu1 %v3332_v56  ;;  %v1185_v12 = vadd.f32 %v1184_v7, %v1172_v6  ;;  %v3964_v55 = vld [vmem:[#allocation10 + $0x294] sm:$0xf0]  ;;  %v3894_v56 = vld [vmem:[#allocation10 + $0x6c] sm:$0xf]  ;;  %v3368_v7 = vor.u32 %v3942_v58, %v3365_v59  ;;  %v3603_v58 = vld [vmem:[#allocation10 + $0x3c8] sm:$0xf] }
 0x15a   :  { %v3444_v0 = vor.u32 %v3964_v55, %v3443_v52  ;;  %v3176_v1 = vor.u32 %v3894_v56, %v3173_v57  ;;  %v3938_v6 = vld [vmem:[#allocation10 + $0x1cc] sm:$0xf]  ;;  %v3620_v52 = vor.u32 %v4008_v42, %v3619_v41  ;;  %v3304_v56 = vor.u32 %v3926_v44, %v3301_v45  ;;  %v4004_v59 = vld [vmem:[#allocation10 + $0x3d4] sm:$0xf0]  ;;  %v3507_v42 = vld [vmem:[#allocation10 + $0x308] sm:$0xf] }
 0x15b   :  { %vm1242_vm8 = vcmp.ge.f32.partialorder %v1185_v12, 0.0  ;;  %v1246_v20 = vmul.f32 0.01, %v1185_v12  ;;  %v3604_v2 = vor.u32 %v4004_v59, %v3603_v58  ;;  %v3946_v44 = vld [vmem:[#allocation10 + $0x20c] sm:$0xf] }
 0x15c   :  { %v3381_v45 = vld [vmem:[#allocation10 + $0x218] sm:$0xf0]  ;;  %v3994_v58 = vld [vmem:[#allocation10 + $0x38c] sm:$0xf] }
 0x15d   :  { %2147 = vmatpush.bf16.msrb.mxu0 %v3124_v8  ;;  %2156 = vmatpush.bf16.msrb.mxu1 %v3316_v9  ;;  %v1250_v22 = vsel %vm1242_vm8, %v1185_v12, %v1246_v20  ;;  %v3349_v8 = vld [vmem:[#allocation10 + $0x1d8] sm:$0xf0]  ;;  %v3411_v12 = vld [vmem:[#allocation10 + $0x248] sm:$0xf] }
 0x15e   :  { %v4352_v27 = vpack.c.bf16 %v1250_v22, %v1250_v22  ;;  %v1173_v28 = vpop.f32.mrf.mxu2  ;;  %v1186_v29 = vpop.f32.mrf.mxu3  ;;  %v3352_v14 = vor.u32 %v3938_v6, %v3349_v8  ;;  %v3144_v22 = vor.u32 %v3886_v16, %v3141_v17  ;;  %v3918_v6 = vld [vmem:[#allocation10 + $0x12c] sm:$0xf]  ;;  %v3269_v8 = vld [vmem:[#allocation10 + $0x138] sm:$0xf0] }
 0x15f   :  { %v3882_v28 = vld [vmem:[#allocation10 + $0xc] sm:$0xf]  ;;  %v3125_v29 = vld [vmem:[#allocation10 + $0x18] sm:$0xf0] }
 0x160   :  { %2109 = vmatmul.bf16.vlgmr.msra.gmra.mxu1 %v4348_v35  ;;  %2148 = vmatmul.bf16.vlgmr.msrb.gmra.mxu0 %v4342_v49  ;;  %v3128_v39 = vor.u32 %v3882_v28, %v3125_v29  ;;  %v3962_v16 = vld [vmem:[#allocation10 + $0x28c] sm:$0xf]  ;;  %v3445_v17 = vld [vmem:[#allocation10 + $0x298] sm:$0xf0]  ;;  %v3988_v28 = vld [vmem:[#allocation10 + $0x354] sm:$0xf0] }
 0x161   :  { %2192 = vmatpush.bf16.msra.mxu0 %v3240_v13  ;;  %2070 = vmatmul.bf16.vlgmr.msrb.gmra.mxu2 %v4352_v27  ;;  %v3954_v29 = vld [vmem:[#allocation10 + $0x24c] sm:$0xf]  ;;  %v3573_v59 = vld [vmem:[#allocation10 + $0x398] sm:$0xf0] }
 0x162   :  { %2157 = vmatpush.bf16.msrb.mxu1 %v3300_v21  ;;  %2166 = vmatpush.bf16.msrb.mxu2 %v3492_v60  ;;  %v3412_v21 = vor.u32 %v3956_v15, %v3411_v12  ;;  %v3395_v60 = vld [vmem:[#allocation10 + $0x228] sm:$0xf]  ;;  %v3253_v15 = vld [vmem:[#allocation10 + $0x118] sm:$0xf0] }
 0x165   :  { %2193 = vmatpush.bf16.msra.mxu0 %v3224_v23 }
 0x166   :  { %2158 = vmatpush.bf16.msrb.mxu1 %v3284_v36  ;;  %2167 = vmatpush.bf16.msrb.mxu2 %v3476_v37  ;;  %v3379_v36 = vld [vmem:[#allocation10 + $0x208] sm:$0xf] }
 0x167   :  { %v3380_v51 = vor.u32 %v3948_v40, %v3379_v36  ;;  %v3523_v36 = vld [vmem:[#allocation10 + $0x328] sm:$0xf] }
 0x169   :  { %2194 = vmatpush.bf16.msra.mxu0 %v3208_v38  ;;  %v3396_v38 = vor.u32 %v3952_v26, %v3395_v60  ;;  %v3958_v60 = vld [vmem:[#allocation10 + $0x26c] sm:$0xf]  ;;  %v3539_v26 = vld [vmem:[#allocation10 + $0x348] sm:$0xf] }
 0x16a   :  { %v1197_v53 = vpop.f32.mrf.mxu0  ;;  %v1210_v54 = vpop.f32.mrf.mxu1  ;;  %2159 = vmatpush.bf16.msrb.mxu1 %v3268_v46  ;;  %2168 = vmatpush.bf16.msrb.mxu2 %v3460_v47  ;;  %v3974_v46 = vld [vmem:[#allocation10 + $0x2ec] sm:$0xf]  ;;  %v3540_v31 = vor.u32 %v3988_v28, %v3539_v26  ;;  %v4021_v26 = vld [vmem:[#allocation11 + $0x60] sm:$0xff] }
 0x16b   :  { %v1198_v9 = vadd.f32 %v1197_v53, %v391_v63  ;;  %v3285_v63 = vld [vmem:[#allocation10 + $0x158] sm:$0xf0] }
 0x16d   :  { %2195 = vmatpush.bf16.msra.mxu0 %v3192_v48  ;;  %v1211_v20 = vadd.f32 %v1210_v54, %v1198_v9  ;;  %v3493_v48 = vld [vmem:[#allocation10 + $0x2f8] sm:$0xf0]  ;;  %v3966_v9 = vld [vmem:[#allocation10 + $0x2ac] sm:$0xf] }
 0x16e   :  { %2160 = vmatpush.bf16.msrb.mxu1 %v3252_v62  ;;  %2169 = vmatpush.bf16.msrb.mxu2 %v3444_v0  ;;  %v3496_v57 = vor.u32 %v3974_v46, %v3493_v48  ;;  %v3922_v62 = vld [vmem:[#allocation10 + $0x14c] sm:$0xf] }
 0x16f   :  { %v3970_v0 = vld [vmem:[#allocation10 + $0x2cc] sm:$0xf] }
 0x170   :  { %v4006_v46 = vld [vmem:[#allocation10 + $0x3ec] sm:$0xf] }
 0x171   :  { %2196 = vmatpush.bf16.msra.mxu0 %v3176_v1  ;;  %2161 = vmatmul.bf16.vlgmr.msrb.gmra.mxu1 %v4348_v35  ;;  %v3477_v1 = vld [vmem:[#allocation10 + $0x2d8] sm:$0xf0] }
 0x172   :  { %2205 = vmatpush.bf16.msra.mxu1 %v3368_v7  ;;  %v1199_v13 = vpop.f32.mrf.mxu0  ;;  %v1212_v32 = vpop.f32.mrf.mxu1  ;;  %2122 = vmatmul.bf16.vlgmr.msra.gmra.mxu2 %v4352_v27  ;;  %v3288_v7 = vor.u32 %v3922_v62, %v3285_v63  ;;  %v3480_v3 = vor.u32 %v3970_v0, %v3477_v1  ;;  %v3576_v62 = vor.u32 %v3994_v58, %v3573_v59  ;;  %v3990_v63 = vld [vmem:[#allocation10 + $0x36c] sm:$0xf]  ;;  %v3557_v0 = vld [vmem:[#allocation10 + $0x378] sm:$0xf0]  ;;  %v1385_v59 = vperm.slane %v4339_v25, 6 }
 0x173   :  { %2170 = vmatpush.bf16.msrb.mxu2 %v3428_v10  ;;  %v3461_v10 = vld [vmem:[#allocation10 + $0x2b8] sm:$0xf0]  ;;  %v3571_v13 = vld [vmem:[#allocation10 + $0x388] sm:$0xf]  ;;  %v3996_v32 = vld [vmem:[#allocation10 + $0x394] sm:$0xf0]  ;;  %v3560_v1 = vor.u32 %v3990_v63, %v3557_v0 }
 0x174   :  { %v3464_v12 = vor.u32 %v3966_v9, %v3461_v10  ;;  %v3572_v18 = vor.u32 %v3996_v32, %v3571_v13  ;;  %v4025_v0 = vld [vmem:[#allocation11 + $0x80] sm:$0xff] }
 0x175   :  { %2197 = vmatpush.bf16.msra.mxu0 %v3160_v11  ;;  %v3588_v11 = vor.u32 %v4000_v5, %v3587_v4  ;;  %v3982_v4 = vld [vmem:[#allocation10 + $0x32c] sm:$0xf]  ;;  %v3525_v5 = vld [vmem:[#allocation10 + $0x338] sm:$0xf0] }
 0x176   :  { %2206 = vmatpush.bf16.msra.mxu1 %v3352_v14  ;;  %v1223_v23 = vpop.f32.mrf.mxu2  ;;  %v1236_v61 = vpop.f32.mrf.mxu3  ;;  %v3914_v14 = vld [vmem:[#allocation10 + $0x10c] sm:$0xf] }
 0x177   :  { %v1224_v30 = vadd.f32 %v1223_v23, %v1211_v20  ;;  %2171 = vmatpush.bf16.msrb.mxu2 %v3412_v21  ;;  %v3256_v19 = vor.u32 %v3914_v14, %v3253_v15  ;;  %v3448_v20 = vor.u32 %v3962_v16, %v3445_v17  ;;  %v3555_v21 = vld [vmem:[#allocation10 + $0x368] sm:$0xf]  ;;  %v3429_v23 = vld [vmem:[#allocation10 + $0x278] sm:$0xf0]  ;;  %v4013_v15 = vld [vmem:[#allocation11 + $0x20] sm:$0xff] }
 0x178   :  { %v4014_v14 = vld [vmem:[#allocation11 + $0x28] sm:$0xff] }
 0x179   :  { %v1237_v37 = vadd.f32 %v1236_v61, %v1224_v30  ;;  %2198 = vmatpush.bf16.msra.mxu0 %v3144_v22  ;;  %v3992_v22 = vld [vmem:[#allocation10 + $0x374] sm:$0xf0]  ;;  %v3413_v30 = vld [vmem:[#allocation10 + $0x258] sm:$0xf0] }
 0x17a   :  { %2207 = vmatpush.bf16.msra.mxu1 %v3336_v24  ;;  %v3556_v61 = vor.u32 %v3992_v22, %v3555_v21  ;;  %v3432_v24 = vor.u32 %v3958_v60, %v3429_v23  ;;  %v3416_v34 = vor.u32 %v3954_v29, %v3413_v30  ;;  %v4010_v60 = vld [vmem:[#allocation11 + $0x8] sm:$0xff]  ;;  %v4020_v30 = vld [vmem:[#allocation11 + $0x58] sm:$0xff] }
 0x17b   :  { %vm1243_vm9 = vcmp.ge.f32.partialorder %v1237_v37, 0.0  ;;  %v1247_v47 = vmul.f32 0.01, %v1237_v37  ;;  %2172 = vmatpush.bf16.msrb.mxu2 %v3396_v38  ;;  %v3950_v38 = vld [vmem:[#allocation10 + $0x22c] sm:$0xf] }
 0x17c   :  { %v4022_v23 = vld [vmem:[#allocation11 + $0x68] sm:$0xff] }
 0x17d   :  { %v1251_v50 = vsel %vm1243_vm9, %v1237_v37, %v1247_v47  ;;  %2199 = vmatpush.bf16.msra.mxu0 %v3128_v39  ;;  %v3984_v37 = vld [vmem:[#allocation10 + $0x334] sm:$0xf0]  ;;  %v3397_v39 = vld [vmem:[#allocation10 + $0x238] sm:$0xf0] }
 0x17e   :  { %v4360_v53 = vpack.c.bf16 %v1251_v50, %v1251_v50  ;;  %2208 = vmatpush.bf16.msra.mxu1 %v3320_v43  ;;  %v1225_v54 = vpop.f32.mrf.mxu2  ;;  %v1238_v55 = vpop.f32.mrf.mxu3  ;;  %v3524_v40 = vor.u32 %v3984_v37, %v3523_v36  ;;  %v3400_v41 = vor.u32 %v3950_v38, %v3397_v39  ;;  %v3980_v43 = vld [vmem:[#allocation10 + $0x314] sm:$0xf0]  ;;  %v3621_v47 = vld [vmem:[#allocation10 + $0x3f8] sm:$0xf0]  ;;  %v4019_v36 = vld [vmem:[#allocation11 + $0x50] sm:$0xff] }
 0x17f   :  { %2173 = vmatpush.bf16.msrb.mxu2 %v3380_v51  ;;  %v3508_v48 = vor.u32 %v3980_v43, %v3507_v42  ;;  %v3624_v50 = vor.u32 %v4006_v46, %v3621_v47  ;;  %v4002_v51 = vld [vmem:[#allocation10 + $0x3cc] sm:$0xf]  ;;  %v4031_v37 = vld [vmem:[#allocation11 + $0xb0] sm:$0xff]  ;;  %v4017_v43 = vld [vmem:[#allocation11 + $0x40] sm:$0xff] }
 0x180   :  { %2083 = vmatmul.bf16.vlgmr.msrb.gmra.mxu3 %v4360_v53  ;;  %2200 = vmatmul.bf16.vlgmr.msra.gmra.mxu0 %v4342_v49  ;;  %v3272_v49 = vor.u32 %v3918_v6, %v3269_v8  ;;  %v3998_v55 = vld [vmem:[#allocation10 + $0x3ac] sm:$0xf]  ;;  %v3528_v6 = vor.u32 %v3982_v4, %v3525_v5  ;;  %v4028_v47 = vld [vmem:[#allocation11 + $0x98] sm:$0xff]  ;;  %v4039_v5 = vld [vmem:[#allocation11 + $0xf0] sm:$0xff] }
 0x181   :  { %2179 = vmatpush.bf16.msrb.mxu3 %v3620_v52  ;;  %v3605_v52 = vld [vmem:[#allocation10 + $0x3d8] sm:$0xf0]  ;;  %v3978_v8 = vld [vmem:[#allocation10 + $0x30c] sm:$0xf] }
 0x182   :  { %2209 = vmatpush.bf16.msra.mxu1 %v3304_v56  ;;  %2174 = vmatmul.bf16.vlgmr.msrb.gmra.mxu2 %v4352_v27  ;;  %v3608_v54 = vor.u32 %v4002_v51, %v3605_v52  ;;  %v3589_v56 = vld [vmem:[#allocation10 + $0x3b8] sm:$0xf0]  ;;  %v4018_v39 = vld [vmem:[#allocation11 + $0x48] sm:$0xff] }
 0x183   :  { %2218 = vmatpush.bf16.msra.mxu2 %v3496_v57  ;;  %v3592_v57 = vor.u32 %v3998_v55, %v3589_v56  ;;  %v4026_v56 = vld [vmem:[#allocation11 + $0x88] sm:$0xff] }
 0x185   :  { %2180 = vmatpush.bf16.msrb.mxu3 %v3604_v2  ;;  %v3986_v2 = vld [vmem:[#allocation10 + $0x34c] sm:$0xf] }
 0x186   :  { %2210 = vmatpush.bf16.msra.mxu1 %v3288_v7  ;;  %v3541_v7 = vld [vmem:[#allocation10 + $0x358] sm:$0xf0] }
 0x187   :  { %2219 = vmatpush.bf16.msra.mxu2 %v3480_v3  ;;  %v3544_v3 = vor.u32 %v3986_v2, %v3541_v7 }
 0x189   :  { %2181 = vmatpush.bf16.msrb.mxu3 %v3588_v11 }
 0x18a   :  { %2211 = vmatpush.bf16.msra.mxu1 %v3272_v49  ;;  %v4016_v49 = vld [vmem:[#allocation11 + $0x38] sm:$0xff] }
 0x18b   :  { %2220 = vmatpush.bf16.msra.mxu2 %v3464_v12  ;;  %2520 = vmatpush.bf16.msrb.mxu0 %v4016_v49  ;;  %v4015_v12 = vld [vmem:[#allocation11 + $0x30] sm:$0xff] }
 0x18d   :  { %2182 = vmatpush.bf16.msrb.mxu3 %v3572_v18  ;;  %v4024_v18 = vld [vmem:[#allocation11 + $0x78] sm:$0xff] }
 0x18e   :  { %2212 = vmatpush.bf16.msra.mxu1 %v3256_v19  ;;  %v4012_v19 = vld [vmem:[#allocation11 + $0x18] sm:$0xff] }
 0x18f   :  { %2221 = vmatpush.bf16.msra.mxu2 %v3448_v20  ;;  %2521 = vmatpush.bf16.msrb.mxu0 %v4015_v12  ;;  %v4023_v20 = vld [vmem:[#allocation11 + $0x70] sm:$0xff] }
 0x190   :  { %2135 = vmatmul.bf16.vlgmr.msra.gmra.mxu3 %v4360_v53 }
 0x191   :  { %2183 = vmatpush.bf16.msrb.mxu3 %v3556_v61  ;;  %2213 = vmatmul.bf16.vlgmr.msra.gmra.mxu1 %v4348_v35  ;;  %v3384_v35 = vor.u32 %v3946_v44, %v3381_v45  ;;  %v4029_v44 = vld [vmem:[#allocation11 + $0xa0] sm:$0xff] }
 0x192   :  { %2533 = vmatpush.bf16.msrb.mxu1 %v4024_v18 }
 0x193   :  { %2222 = vmatpush.bf16.msra.mxu2 %v3432_v24  ;;  %2522 = vmatpush.bf16.msrb.mxu0 %v4014_v14  ;;  %v4009_v24 = vld [vmem:[#allocation11] sm:$0xff]  ;;  %v1386_v14 = vperm.slane %v4345_v33, 2 }
 0x195   :  { %2184 = vmatpush.bf16.msrb.mxu3 %v3540_v31  ;;  %v4032_v31 = vld [vmem:[#allocation11 + $0xb8] sm:$0xff] }
 0x196   :  { %2534 = vmatpush.bf16.msrb.mxu1 %v4023_v20 }
 0x197   :  { %2223 = vmatpush.bf16.msra.mxu2 %v3416_v34  ;;  %2523 = vmatpush.bf16.msrb.mxu0 %v4013_v15 }
 0x199   :  { %2185 = vmatpush.bf16.msrb.mxu3 %v3524_v40  ;;  %v4030_v40 = vld [vmem:[#allocation11 + $0xa8] sm:$0xff] }
 0x19a   :  { %2535 = vmatpush.bf16.msrb.mxu1 %v4022_v23 }
 0x19b   :  { %2224 = vmatpush.bf16.msra.mxu2 %v3400_v41  ;;  %2524 = vmatpush.bf16.msrb.mxu0 %v4012_v19  ;;  %v1384_v41 = vperm.slane %v4339_v25, 2  ;;  %v1394_v19 = vperm.slane %v1386_v14, 2 }
 0x19d   :  { %2186 = vmatpush.bf16.msrb.mxu3 %v3508_v48  ;;  %v1392_v46 = vperm.slane %v1384_v41, 2 }
 0x19e   :  { %2536 = vmatpush.bf16.msrb.mxu1 %v4021_v26 }
 0x19f   :  { %2225 = vmatpush.bf16.msra.mxu2 %v3384_v35  ;;  %v4027_v35 = vld [vmem:[#allocation11 + $0x90] sm:$0xff] }
 0x1a0   :  { %2187 = vmatmul.bf16.vlgmr.msrb.gmra.mxu3 %v4360_v53 }
 0x1a1   :  { %2231 = vmatpush.bf16.msra.mxu3 %v3624_v50 }
 0x1a2   :  { %2226 = vmatmul.bf16.vlgmr.msra.gmra.mxu2 %v4352_v27  ;;  %v3509_v27 = vld [vmem:[#allocation10 + $0x318] sm:$0xf0]  ;;  %2537 = vmatpush.bf16.msrb.mxu1 %v4020_v30 }
 0x1a3   :  { %v3512_v9 = vor.u32 %v3978_v8, %v3509_v27  ;;  %2546 = vmatpush.bf16.msrb.mxu2 %v4032_v31 }
 0x1a5   :  { %2232 = vmatpush.bf16.msra.mxu3 %v3608_v54 }
 0x1a6   :  { %2538 = vmatpush.bf16.msrb.mxu1 %v4019_v36 }
 0x1a7   :  { %2547 = vmatpush.bf16.msrb.mxu2 %v4031_v37  ;;  %v1387_v37 = vperm.slane %v4345_v33, 6  ;;  %v4052_v33 = vld [vmem:[%s4401_s6] ss:$0 sm:$0xff] }
 0x1a9   :  { %2233 = vmatpush.bf16.msra.mxu3 %v3592_v57 }
 0x1aa   :  { %2539 = vmatpush.bf16.msrb.mxu1 %v4018_v39 }
 0x1ab   :  { %2548 = vmatpush.bf16.msrb.mxu2 %v4030_v40 }
 0x1ad   :  { %2234 = vmatpush.bf16.msra.mxu3 %v3576_v62 }
 0x1ae   :  { %2540 = vmatpush.bf16.msrb.mxu1 %v4017_v43 }
 0x1af   :  { %2549 = vmatpush.bf16.msrb.mxu2 %v4029_v44 }
 0x1b1   :  { %2235 = vmatpush.bf16.msra.mxu3 %v3560_v1  ;;  %v4040_v1 = vld [vmem:[#allocation11 + $0xf8] sm:$0xff] }
 0x1b3   :  { %2550 = vmatpush.bf16.msrb.mxu2 %v4028_v47 }
 0x1b5   :  { %2236 = vmatpush.bf16.msra.mxu3 %v3544_v3  ;;  %v1393_v3 = vperm.slane %v1385_v59, 2 }
 0x1b7   :  { %2551 = vmatpush.bf16.msrb.mxu2 %v4027_v35 }
 0x1b9   :  { %2237 = vmatpush.bf16.msra.mxu3 %v3528_v6  ;;  %v4038_v6 = vld [vmem:[#allocation11 + $0xe8] sm:$0xff] }
 0x1bb   :  { %2552 = vmatpush.bf16.msrb.mxu2 %v4026_v56 }
 0x1bd   :  { %2238 = vmatpush.bf16.msra.mxu3 %v3512_v9  ;;  %v2045_v10 = vpop.f32.mrf.mxu0 }
 0x1be   :  { %v2046_v50 = vadd.f32 %v2045_v10, %v1392_v46  ;;  %v4037_v10 = vld [vmem:[#allocation11 + $0xe0] sm:$0xff] }
 0x1bf   :  { %2553 = vmatpush.bf16.msrb.mxu2 %v4025_v0 }
 0x1c0   :  { %2239 = vmatmul.bf16.vlgmr.msra.gmra.mxu3 %v4360_v53  ;;  %v4011_v53 = vld [vmem:[#allocation11 + $0x10] sm:$0xff] }
 0x1c1   :  { %2525 = vmatpush.bf16.msrb.mxu0 %v4011_v53  ;;  %2559 = vmatpush.bf16.msrb.mxu3 %v4040_v1 }
 0x1c5   :  { %v2047_v11 = vpop.f32.mrf.mxu0  ;;  %2526 = vmatpush.bf16.msrb.mxu0 %v4010_v60  ;;  %2560 = vmatpush.bf16.msrb.mxu3 %v4039_v5 }
 0x1c9   :  { %2527 = vmatpush.bf16.msrb.mxu0 %v4009_v24  ;;  %2561 = vmatpush.bf16.msrb.mxu3 %v4038_v6  ;;  %v4033_v24 = vld [vmem:[#allocation11 + $0xc0] sm:$0xff] }
 0x1cd   :  { %v2058_v13 = vpop.f32.mrf.mxu1  ;;  %v4370_v32 = vpop.f32.mrf.mxu0  ;;  %2562 = vmatpush.bf16.msrb.mxu3 %v4037_v10 }
 0x1ce   :  { %v2059_v52 = vadd.f32 %v2058_v13, %v2046_v50  ;;  %v2098_v8 = vadd.f32 %v4370_v32, %v1393_v3  ;;  %v4036_v13 = vld [vmem:[#allocation11 + $0xd8] sm:$0xff]  ;;  %v4035_v32 = vld [vmem:[#allocation11 + $0xd0] sm:$0xff] }
 0x1d1   :  { %2563 = vmatpush.bf16.msrb.mxu3 %v4036_v13 }
 0x1d5   :  { %v2060_v16 = vpop.f32.mrf.mxu1  ;;  %v2099_v17 = vpop.f32.mrf.mxu0  ;;  %2564 = vmatpush.bf16.msrb.mxu3 %v4035_v32 }
 0x1dd   :  { %v4372_v21 = vpop.f32.mrf.mxu1  ;;  %v4374_v22 = vpop.f32.mrf.mxu0 }
 0x1de   :  { %v2111_v25 = vadd.f32 %v4372_v21, %v2098_v8  ;;  %v2150_v20 = vadd.f32 %v4374_v22, %v1394_v19  ;;  %v4034_v21 = vld [vmem:[#allocation11 + $0xc8] sm:$0xff]  ;;  %v1395_v22 = vperm.slane %v1387_v37, 2 }
 0x1df   :  { %2565 = vmatpush.bf16.msrb.mxu3 %v4034_v21 }
 0x1e3   :  { %2566 = vmatpush.bf16.msrb.mxu3 %v4033_v24 }
 0x1e4   :  { %v2071_v61 = vpop.f32.mrf.mxu2 }
 0x1e5   :  { %v2112_v28 = vpop.f32.mrf.mxu1  ;;  %v2151_v29 = vpop.f32.mrf.mxu0  ;;  %v2072_v54 = vadd.f32 %v2071_v61, %v2059_v52 }
 0x1ec   :  { %v2073_v34 = vpop.f32.mrf.mxu2 }
 0x1ee   :  { %v4376_v38 = vpop.f32.mrf.mxu1 }
 0x1ef   :  { %v2163_v60 = vadd.f32 %v4376_v38, %v2150_v20 }
 0x1f5   :  { %v2123_v42 = vpop.f32.mrf.mxu2 }
 0x1f6   :  { %v2164_v45 = vpop.f32.mrf.mxu1  ;;  %v2124_v11 = vadd.f32 %v2123_v42, %v2111_v25 }
 0x1fd   :  { %v4379_v48 = vpop.f32.mrf.mxu0  ;;  %v2125_v51 = vpop.f32.mrf.mxu2 }
 0x1fe   :  { %v2202_v39 = vadd.f32 %v4379_v48, %v1395_v22 }
 0x203   :  { %v2084_v55 = vpop.f32.mrf.mxu3 }
 0x204   :  { %v2085_v57 = vadd.f32 %v2084_v55, %v2072_v54 }
 0x205   :  { %v2203_v58 = vpop.f32.mrf.mxu0  ;;  %v2175_v63 = vpop.f32.mrf.mxu2 }
 0x206   :  { %vm2244_vm10 = vcmp.ge.f32.partialorder %v2085_v57, 0.0  ;;  %v2248_v62 = vmul.f32 0.01, %v2085_v57  ;;  %v2176_v23 = vadd.f32 %v2175_v63, %v2163_v60 }
 0x208   :  { %v2252_v2 = vsel %vm2244_vm10, %v2085_v57, %v2248_v62 }
 0x209   :  { %v2256_v7 = vpack.c.bf16 %v2252_v2, %v2252_v2 }
 0x20b   :  { %v2086_v4 = vpop.f32.mrf.mxu3  ;;  %2528 = vmatmul.bf16.vlgmr.msrb.gmra.mxu0 %v2256_v7 }
 0x20d   :  { %v2177_v9 = vpop.f32.mrf.mxu2 }
 0x20e   :  { %v2214_v27 = vpop.f32.mrf.mxu1 }
 0x20f   :  { %v2215_v38 = vadd.f32 %v2214_v27, %v2202_v39 }
 0x213   :  { %v2136_v49 = vpop.f32.mrf.mxu3 }
 0x214   :  { %v2137_v12 = vadd.f32 %v2136_v49, %v2124_v11 }
 0x216   :  { %vm2245_vm11 = vcmp.ge.f32.partialorder %v2137_v12, 0.0  ;;  %v2249_v15 = vmul.f32 0.01, %v2137_v12  ;;  %v2216_v16 = vpop.f32.mrf.mxu1 }
 0x218   :  { %v2253_v17 = vsel %vm2245_vm11, %v2137_v12, %v2249_v15 }
 0x219   :  { %v2257_v18 = vpack.c.bf16 %v2253_v17, %v2253_v17 }
 0x21b   :  { %v2138_v53 = vpop.f32.mrf.mxu3  ;;  %2541 = vmatmul.bf16.vlgmr.msrb.gmra.mxu1 %v2257_v18 }
 0x223   :  { %v2188_v61 = vpop.f32.mrf.mxu3 }
 0x224   :  { %v2189_v26 = vadd.f32 %v2188_v61, %v2176_v23 }
 0x225   :  { %v2227_v28 = vpop.f32.mrf.mxu2 }
 0x226   :  { %vm2246_vm12 = vcmp.ge.f32.partialorder %v2189_v26, 0.0  ;;  %v2250_v29 = vmul.f32 0.01, %v2189_v26  ;;  %v2228_v40 = vadd.f32 %v2227_v28, %v2215_v38 }
 0x228   :  { %v2254_v30 = vsel %vm2246_vm12, %v2189_v26, %v2250_v29 }
 0x229   :  { %v2258_v31 = vpack.c.bf16 %v2254_v30, %v2254_v30 }
 0x22b   :  { %v2190_v34 = vpop.f32.mrf.mxu3  ;;  %2554 = vmatmul.bf16.vlgmr.msrb.gmra.mxu2 %v2258_v31 }
 0x22d   :  { %v2229_v36 = vpop.f32.mrf.mxu2 }
 0x243   :  { %v2240_v41 = vpop.f32.mrf.mxu3 }
 0x244   :  { %v2241_v42 = vadd.f32 %v2240_v41, %v2228_v40 }
 0x246   :  { %vm2247_vm13 = vcmp.ge.f32.partialorder %v2241_v42, 0.0  ;;  %v2251_v43 = vmul.f32 0.01, %v2241_v42 }
 0x248   :  { %v2255_v44 = vsel %vm2247_vm13, %v2241_v42, %v2251_v43 }
 0x249   :  { %v2259_v45 = vpack.c.bf16 %v2255_v44, %v2255_v44 }
 0x24b   :  { %v2242_v46 = vpop.f32.mrf.mxu3  ;;  %2567 = vmatmul.bf16.vlgmr.msrb.gmra.mxu3 %v2259_v45 }
 0x288   :  { %v2529_v47 = vpop.f32.mrf.mxu0 }
 0x289   :  { %v2530_v48 = vadd.f32 %v4052_v33, %v2529_v47 }
 0x290   :  { %v2531_v35 = vpop.f32.mrf.mxu0 }
 0x298   :  { %v2542_v50 = vpop.f32.mrf.mxu1 }
 0x299   :  { %v2543_v55 = vadd.f32 %v2542_v50, %v2530_v48 }
 0x2a0   :  { %v2544_v51 = vpop.f32.mrf.mxu1 }
 0x2ae   :  { %v2555_v52 = vpop.f32.mrf.mxu2 }
 0x2af   :  { %v2556_v56 = vadd.f32 %v2555_v52, %v2543_v55 }
 0x2b6   :  { %v2557_v54 = vpop.f32.mrf.mxu2 }
 0x2ce   :  { %v2568_v57 = vpop.f32.mrf.mxu3 }
 0x2cf   :  { %v2569_v58 = vadd.f32 %v2568_v57, %v2556_v56 }
 0x2d1   :  { %2572 = vst [vmem:[#allocation13] sm:$0x3] %v2569_v58 }
 0x2d2   :  { %2583 = dma.vmem_to_hbm [thread:$0]  %s2579_s9, 32, %s2581_s12, [#allocation4]  }
 0x2d6   :  { %v2570_v59 = vpop.f32.mrf.mxu3 }
 0x2d7   :  { %4231 = dma.done.wait [#allocation4], 32  }
 0x2d8   :  { %4232 = vsyncadd [#allocation4], 4294967264 }
 0x2d9   :  { %2588 = vsyncpa [#allocation3], 1 }
 0x2da   :  { %2589 = vsyncpa [#allocation6], 1 }
 0x2db   :  { %2590 = vsyncpa [#allocation9], 1 }
 0x2dc   :  { %2591 = vsyncpa [#allocation12], 1 }
 0x2dd   :  { %2592 = vsyncpa [#allocation4], 1 }

</bundles_post_ra>
